<compile_context>
chip_gen: v7x
topology: tpu7x:2x2x1
jax: 0.10.0
libtpu: 0.0.40
codegen_flags: <defaults>
</compile_context>

<pallas_src>
import jax
import jax.numpy as jnp
from jax.experimental import pallas as pl
from jax.experimental.pallas import tpu as pltpu

EPS = 1e-5  # nn.GroupNorm default eps


def _dot(a, b):
    # Single-pass MXU matmul (default precision) with f32 accumulation.
    return jnp.dot(a, b, preferred_element_type=jnp.float32)


# ----------------------------- fused kernel -----------------------------
def _build_kernel(num_layers, B, T):
    n_in = 1 + 3 * num_layers + 14

    def kernel(*refs):
        in_refs = refs[:n_in]
        out_sm_ref, feat_out_ref, feat1_ref, emb_out_ref = refs[n_in:n_in + 4]
        hseq_ref = refs[n_in + 4]                    # (T*B, H) VMEM scratch

        x_ref = in_refs[0]                           # (T*B, F) time-major, row = t*B + b
        lstm_refs = [in_refs[1 + 3 * l: 4 + 3 * l] for l in range(num_layers)]
        (wembT_ref, bemb_ref, gnw_ref, gnb_ref, A2_ref, sel_ref, wattn_ref,
         battn_ref, w0T_ref, b0l_ref, w1T_ref, b1l_ref, w2T_ref, b2l_ref) = \
            in_refs[1 + 3 * num_layers:]

        H = lstm_refs[0][1].shape[0]
        E = wembT_ref.shape[1]
        TB = T * B

        # ---------------- stacked LSTM ----------------
        # Hoisted layer-0 input projection (+bias): one matmul, off the recurrence path.
        wih0 = lstm_refs[0][0][...]                  # (F, 4H) f32
        bias0 = lstm_refs[0][2][...]                 # (1, 4H) f32
        xw0 = _dot(x_ref[...], wih0) + bias0         # (T*B, 4H) f32
        xw_steps = [xw0[t * B:(t + 1) * B, :] for t in range(T)]   # contiguous slices

        whh = [lstm_refs[l][1][...] for l in range(num_layers)]               # bf16 (H,4H)
        wih = [None] + [lstm_refs[l][0][...] for l in range(1, num_layers)]   # bf16 (H,4H)
        bfs = [None] + [lstm_refs[l][2][...] for l in range(1, num_layers)]   # f32  (1,4H)

        h_bf = [None] * num_layers    # bf16 hidden state (MXU operand)
        c = [None] * num_layers       # f32 cell state (VPU)

        # Fully unrolled: layer l step t depends only on layer l-1 step t and layer l
        # step t-1, so layer-1 step t overlaps layer-0 step t+1 in the scheduler.
        for t in range(T):
            for li in range(num_layers):
                if li == 0:
                    gates = xw_steps[t]
                else:
                    gates = _dot(h_bf[li - 1], wih[li]) + bfs[li]
                if t > 0:                                    # h == 0 at t == 0: skip dot
                    gates = gates + _dot(h_bf[li], whh[li])
                sg = jax.nn.sigmoid(gates)                   # one EUP op over full (B,4H)
                tg = jnp.tanh(gates[:, 2 * H:3 * H])         # tanh only on the g block
                gi = sg[:, 0 * H:1 * H]
                gf = sg[:, 1 * H:2 * H]
                go = sg[:, 3 * H:4 * H]
                c[li] = gi * tg if t == 0 else gf * c[li] + gi * tg
                hn = go * jnp.tanh(c[li])                    # f32 state math
                h_bf[li] = hn.astype(jnp.bfloat16)
                if li == num_layers - 1:
                    # One (B,H) store per step; never read during the recurrence,
                    # so it stays off the serial dependency chain.
                    hseq_ref[t * B:(t + 1) * B, :] = hn

        # ---------------- attentive-pooling head (fully batched) ----------------
        hseq = hseq_ref[...]                                              # (T*B, H)
        e = jnp.tanh(_dot(hseq, wembT_ref[...]) + bemb_ref[...])          # (T*B, E)

        # GroupNorm(groups, seg_len): per-(batch, group) mean / E[x^2] with one matmul
        # against the block group-averaging matrix A2 (built in the wrapper).
        stats = _dot(A2_ref[...], jnp.concatenate([e, e * e], axis=1))    # (T*B, 2E)
        m = jnp.sum(stats[:, :E], axis=1, keepdims=True)                  # (T*B, 1)
        m2 = jnp.sum(stats[:, E:], axis=1, keepdims=True)                 # (T*B, 1)
        var = jnp.maximum(m2 - m * m, 0.0)
        inv = jax.lax.rsqrt(var + EPS)
        e_n = gnw_ref[...] * ((e - m) * inv) + gnb_ref[...]               # (T*B, E)

        # attention softmax over seg_len per batch: a single GLOBAL max shift is exact
        # (softmax is invariant to a constant shift within each batch's group).
        logits = jnp.sum(e_n * wattn_ref[...], axis=1, keepdims=True) + battn_ref[...]
        ex = jnp.exp(logits - jnp.max(logits, axis=0, keepdims=True))     # (T*B, 1)
        pooled = _dot(sel_ref[...],
                      jnp.concatenate([ex * e_n, jnp.broadcast_to(ex, (TB, E))],
                                      axis=1))                            # (B, 2E)
        emb = pooled[:, :E] * pl.reciprocal(pooled[:, E:], approx=True)   # (B, E)
        # v3: `embeds.div(embeds.norm(...))` is NOT assigned in the PyTorch forward,
        # so the returned embeds stay un-normalized.

        # ---------------- classifier MLP + softmax (batched) ----------------
        f0 = jnp.maximum(_dot(emb, w0T_ref[...]) + b0l_ref[...], 0.0)     # (B, L)
        f1 = jnp.maximum(_dot(f0, w1T_ref[...]) + b1l_ref[...], 0.0)      # (B, L)
        fo = _dot(f1, w2T_ref[...]) + b2l_ref[...]                        # (B, S)
        fs = fo - jnp.max(fo, axis=1, keepdims=True)
        ex2 = jnp.exp(fs)
        sm = ex2 * pl.reciprocal(jnp.sum(ex2, axis=1, keepdims=True), approx=True)

        # TODO(synk): the four sub-128-lane outputs stay as separate masked stores
        # (packing into one lane-dense (B,128) block is a us-scale win, lowest priority).
        out_sm_ref[...] = sm
        feat_out_ref[...] = fo
        feat1_ref[...] = f1
        emb_out_ref[...] = emb

    return kernel


def forward_pallas(x, p, *, groups):
    """DvecAttentivePooledClsE2E_v3.forward(x) -> (softmax_out, feat_out, feat_1, embeds)."""
    B, T, F = x.shape
    num_layers = len(p["lstm"])
    H = p["lstm"][0][1].shape[0]
    E = p["WembT"].shape[1]
    L = p["W0T"].shape[1]
    S = p["W2T"].shape[1]
    TB = T * B
    gs = T // groups

    # Time-major layout: row r = t*B + b.
    x_tm = jnp.transpose(x, (1, 0, 2)).reshape(TB, F)

    # Constant head matrices in time-major row indexing.
    r = jnp.arange(TB)
    t_of = r // B
    b_of = r % B
    same_b = b_of[:, None] == b_of[None, :]
    same_g = (t_of[:, None] // gs) == (t_of[None, :] // gs)
    A2 = (same_b & same_g).astype(jnp.float32) / float(gs * E)              # (TB, TB)
    Ssel = (jnp.arange(B)[:, None] == b_of[None, :]).astype(jnp.float32)    # (B, TB)
    gnw_rows = jnp.repeat(p["gn_w"], B).reshape(TB, 1)                      # per-channel w
    gnb_rows = jnp.repeat(p["gn_b"], B).reshape(TB, 1)                      # per-channel b

    inputs = [x_tm]
    for li, (wih, whh, bf) in enumerate(p["lstm"]):
        # Recurrence weights pre-cast to bf16 at the call boundary (single-pass MXU);
        # layer 0's wih only feeds the hoisted projection, so it stays f32.
        inputs += [wih if li == 0 else wih.astype(jnp.bfloat16),
                   whh.astype(jnp.bfloat16), bf]
    inputs += [p["WembT"], p["bemb"], gnw_rows, gnb_rows, A2, Ssel,
               p["wattn"], p["battn"], p["W0T"], p["b0l"], p["W1T"], p["b1l"],
               p["W2T"], p["b2l"]]

    def full(a):
        nd = a.ndim
        return pl.BlockSpec(a.shape, lambda i, _n=nd: (0,) * _n)

    out_shape = (jax.ShapeDtypeStruct((B, S), jnp.float32),   # softmax output
                 jax.ShapeDtypeStruct((B, S), jnp.float32),   # feat_out
                 jax.ShapeDtypeStruct((B, L), jnp.float32),   # feat_1
                 jax.ShapeDtypeStruct((B, E), jnp.float32))   # embeds (un-normalized)
    out_specs = [pl.BlockSpec((B, S), lambda i: (0, 0)),
                 pl.BlockSpec((B, S), lambda i: (0, 0)),
                 pl.BlockSpec((B, L), lambda i: (0, 0)),
                 pl.BlockSpec((B, E), lambda i: (0, 0))]

    return pl.pallas_call(
        _build_kernel(num_layers, B, T),
        out_shape=out_shape,
        grid_spec=pltpu.PrefetchScalarGridSpec(
            num_scalar_prefetch=0,
            grid=(1,),
            in_specs=[full(a) for a in inputs],
            out_specs=out_specs,
            scratch_shapes=[pltpu.VMEM((TB, H), jnp.float32)]),
        compiler_params=pltpu.CompilerParams(dimension_semantics=("arbitrary",)),
    )(*inputs)


# ---------------------- deterministic parameter init ----------------------
def init_params(key, F, H, num_layers, E, T, L, S):
    ks = iter(jax.random.split(key, 32))

    def rnd(shape, scale=0.15):
        return jax.random.normal(next(ks), shape, jnp.float32) * scale

    lstm = []
    for layer in range(num_layers):
        in_dim = F if layer == 0 else H
        w_ih = rnd((4 * H, in_dim))      # PyTorch weight_ih_l{k}, gate order i,f,g,o
        w_hh = rnd((4 * H, H))           # weight_hh_l{k}
        b_ih = rnd((4 * H,))
        b_hh = rnd((4 * H,))
        # fused layout: x @ wih -> (..., 4H) with [i|f|g|o] column blocks
        lstm.append((w_ih.T, w_hh.T, (b_ih + b_hh).reshape(1, 4 * H)))

    W_emb = rnd((E, H)); b_emb = rnd((E,))
    W_attn = rnd((1, E)); b_attn = rnd((1,))
    W0 = rnd((L, E)); b0 = rnd((L,))
    W1 = rnd((L, L)); b1 = rnd((L,))
    W2 = rnd((S, L)); b2 = rnd((S,))
    gn_w = 1.0 + rnd((T,), 0.1)          # GroupNorm affine (randomized to exercise path)
    gn_b = rnd((T,), 0.1)

    return dict(
        lstm=lstm,
        WembT=W_emb.T, bemb=b_emb.reshape(1, E),
        gn_w=gn_w, gn_b=gn_b,
        wattn=W_attn.reshape(1, E), battn=b_attn.reshape(1, 1),
        W0T=W0.T, b0l=b0.reshape(1, L),
        W1T=W1.T, b1l=b1.reshape(1, L),
        W2T=W2.T, b2l=b2.reshape(1, S),
    )


# ---------------------------- pure-JAX reference ----------------------------
def _lstm_layer_ref(x_btf, wih, whh, bf):
    B = x_btf.shape[0]
    H = whh.shape[0]

    def step(carry, x_t):
        h, c = carry
        gates = x_t @ wih + h @ whh + bf
        gi = jax.nn.sigmoid(gates[:, :H])
        gf = jax.nn.sigmoid(gates[:, H:2 * H])
        gg = jnp.tanh(gates[:, 2 * H:3 * H])
        go = jax.nn.sigmoid(gates[:, 3 * H:])
        c = gf * c + gi * gg
        h = go * jnp.tanh(c)
        return (h, c), h

    h0 = jnp.zeros((B, H), jnp.float32)
    _, hs = jax.lax.scan(step, (h0, h0), jnp.swapaxes(x_btf, 0, 1))
    return jnp.swapaxes(hs, 0, 1)


def forward_ref(x, p, groups):
    h = x
    for (wih, whh, bf) in p["lstm"]:
        h = _lstm_layer_ref(h, wih, whh, bf)
    B, T, _ = h.shape
    E = p["WembT"].shape[1]

    e = jnp.tanh(h @ p["WembT"] + p["bemb"])                       # (B, T, E)
    eg = e.reshape(B, groups, (T // groups) * E)
    mean = eg.mean(axis=-1, keepdims=True)
    var = jnp.mean((eg - mean) ** 2, axis=-1, keepdims=True)
    en = ((eg - mean) / jnp.sqrt(var + EPS)).reshape(B, T, E)
    en = en * p["gn_w"].reshape(1, T, 1) + p["gn_b"].reshape(1, T, 1)

    logits = en @ p["wattn"].reshape(E, 1) + p["battn"].reshape(1, 1, 1)
    attn = jax.nn.softmax(logits, axis=1)
    emb = jnp.sum(en * attn, axis=1)       # (B, E); v3: .div(norm) result is discarded

    f0 = jax.nn.relu(emb @ p["W0T"] + p["b0l"])
    f1 = jax.nn.relu(f0 @ p["W1T"] + p["b1l"])
    fo = f1 @ p["W2T"] + p["b2l"]
    return jax.nn.softmax(fo, axis=1), fo, f1, emb


if __name__ == "__main__":
    # args: feature_dim=16, dim_cell=64 (hidden=32), num_layers=2, dim_emb=32,
    #       seg_len=8, gp_norm_dvector=4, latent_dim=32, n_speakers=10, batch=2
    B, T, F, DC, NL = 2, 8, 16, 64, 2
    E, G, L, S = 32, 4, 32, 10
    H = DC // 2

    key = jax.random.PRNGKey(0)
    kx, kp = jax.random.split(key)
    x = jax.random.normal(kx, (B, T, F), jnp.float32)
    p = init_params(kp, F, H, NL, E, T, L, S)

    fwd = jax.jit(forward_pallas, static_argnames=("groups",))
    res = jax.block_until_ready(fwd(x, p, groups=G))

    with jax.default_matmul_precision("highest"):
        ref = forward_ref(x, p, G)

    # Kernel matmuls run at single-pass bf16 MXU precision, so compare against the
    # f32 reference at a bf16-appropriate tolerance.
    names = ["out(softmax)", "feat_out", "feat_1", "embeds"]
    for got, want, name in zip(res, ref, names):
        assert got.shape == want.shape, (name, got.shape, want.shape)
        assert bool(jnp.all(jnp.isfinite(got))), name
        assert bool(jnp.allclose(got, want, atol=2e-2, rtol=2e-2)), (
            name, float(jnp.max(jnp.abs(got - want))))

    print("KERNEL_OK")
</pallas_src>

<mosaic_0001>
module attributes {stable_mosaic.version = 11 : i64} {
  func.func @kernel(%arg0: i32, %arg1: memref<16x16xf32, #tpu.memory_space<vmem>>, %arg2: memref<16x128xf32, #tpu.memory_space<vmem>>, %arg3: memref<32x128xbf16, #tpu.memory_space<vmem>>, %arg4: memref<1x128xf32, #tpu.memory_space<vmem>>, %arg5: memref<32x128xbf16, #tpu.memory_space<vmem>>, %arg6: memref<32x128xbf16, #tpu.memory_space<vmem>>, %arg7: memref<1x128xf32, #tpu.memory_space<vmem>>, %arg8: memref<32x32xf32, #tpu.memory_space<vmem>>, %arg9: memref<1x32xf32, #tpu.memory_space<vmem>>, %arg10: memref<16x1xf32, #tpu.memory_space<vmem>>, %arg11: memref<16x1xf32, #tpu.memory_space<vmem>>, %arg12: memref<16x16xf32, #tpu.memory_space<vmem>>, %arg13: memref<2x16xf32, #tpu.memory_space<vmem>>, %arg14: memref<1x32xf32, #tpu.memory_space<vmem>>, %arg15: memref<1x1xf32, #tpu.memory_space<vmem>>, %arg16: memref<32x32xf32, #tpu.memory_space<vmem>>, %arg17: memref<1x32xf32, #tpu.memory_space<vmem>>, %arg18: memref<32x32xf32, #tpu.memory_space<vmem>>, %arg19: memref<1x32xf32, #tpu.memory_space<vmem>>, %arg20: memref<32x10xf32, #tpu.memory_space<vmem>>, %arg21: memref<1x10xf32, #tpu.memory_space<vmem>>, %arg22: memref<2x10xf32, #tpu.memory_space<vmem>>, %arg23: memref<2x10xf32, #tpu.memory_space<vmem>>, %arg24: memref<2x32xf32, #tpu.memory_space<vmem>>, %arg25: memref<2x32xf32, #tpu.memory_space<vmem>>, %arg26: memref<16x32xf32, #tpu.memory_space<vmem>>) attributes {dimension_semantics = [#tpu.dimension_semantics<arbitrary>], iteration_bounds = array<i64: 1>, scalar_prefetch = 0 : i64, scratch_operands = 1 : i64, tpu.core_type = #tpu.core_type<tc>, window_params = [{pipeline_mode = #tpu.pipeline_mode<synchronous>, transform_indices = @transform_0, window_bounds = array<i64: 16, 16>}, {pipeline_mode = #tpu.pipeline_mode<synchronous>, transform_indices = @transform_1, window_bounds = array<i64: 16, 128>}, {pipeline_mode = #tpu.pipeline_mode<synchronous>, transform_indices = @transform_2, window_bounds = array<i64: 32, 128>}, {pipeline_mode = #tpu.pipeline_mode<synchronous>, transform_indices = @transform_3, window_bounds = array<i64: 1, 128>}, {pipeline_mode = #tpu.pipeline_mode<synchronous>, transform_indices = @transform_4, window_bounds = array<i64: 32, 128>}, {pipeline_mode = #tpu.pipeline_mode<synchronous>, transform_indices = @transform_5, window_bounds = array<i64: 32, 128>}, {pipeline_mode = #tpu.pipeline_mode<synchronous>, transform_indices = @transform_6, window_bounds = array<i64: 1, 128>}, {pipeline_mode = #tpu.pipeline_mode<synchronous>, transform_indices = @transform_7, window_bounds = array<i64: 32, 32>}, {pipeline_mode = #tpu.pipeline_mode<synchronous>, transform_indices = @transform_8, window_bounds = array<i64: 1, 32>}, {pipeline_mode = #tpu.pipeline_mode<synchronous>, transform_indices = @transform_9, window_bounds = array<i64: 16, 1>}, {pipeline_mode = #tpu.pipeline_mode<synchronous>, transform_indices = @transform_10, window_bounds = array<i64: 16, 1>}, {pipeline_mode = #tpu.pipeline_mode<synchronous>, transform_indices = @transform_11, window_bounds = array<i64: 16, 16>}, {pipeline_mode = #tpu.pipeline_mode<synchronous>, transform_indices = @transform_12, window_bounds = array<i64: 2, 16>}, {pipeline_mode = #tpu.pipeline_mode<synchronous>, transform_indices = @transform_13, window_bounds = array<i64: 1, 32>}, {pipeline_mode = #tpu.pipeline_mode<synchronous>, transform_indices = @transform_14, window_bounds = array<i64: 1, 1>}, {pipeline_mode = #tpu.pipeline_mode<synchronous>, transform_indices = @transform_15, window_bounds = array<i64: 32, 32>}, {pipeline_mode = #tpu.pipeline_mode<synchronous>, transform_indices = @transform_16, window_bounds = array<i64: 1, 32>}, {pipeline_mode = #tpu.pipeline_mode<synchronous>, transform_indices = @transform_17, window_bounds = array<i64: 32, 32>}, {pipeline_mode = #tpu.pipeline_mode<synchronous>, transform_indices = @transform_18, window_bounds = array<i64: 1, 32>}, {pipeline_mode = #tpu.pipeline_mode<synchronous>, transform_indices = @transform_19, window_bounds = array<i64: 32, 10>}, {pipeline_mode = #tpu.pipeline_mode<synchronous>, transform_indices = @transform_20, window_bounds = array<i64: 1, 10>}, {pipeline_mode = #tpu.pipeline_mode<synchronous>, transform_indices = @transform_21, window_bounds = array<i64: 2, 10>}, {pipeline_mode = #tpu.pipeline_mode<synchronous>, transform_indices = @transform_22, window_bounds = array<i64: 2, 10>}, {pipeline_mode = #tpu.pipeline_mode<synchronous>, transform_indices = @transform_23, window_bounds = array<i64: 2, 32>}, {pipeline_mode = #tpu.pipeline_mode<synchronous>, transform_indices = @transform_24, window_bounds = array<i64: 2, 32>}]} {
    %c0 = arith.constant 0 : index
    %c0_0 = arith.constant 0 : index
    %0 = vector.load %arg2[%c0, %c0_0] : memref<16x128xf32, #tpu.memory_space<vmem>>, vector<16x128xf32>
    %c0_1 = arith.constant 0 : index
    %c0_2 = arith.constant 0 : index
    %1 = vector.load %arg4[%c0_1, %c0_2] : memref<1x128xf32, #tpu.memory_space<vmem>>, vector<1x128xf32>
    %c0_3 = arith.constant 0 : index
    %c0_4 = arith.constant 0 : index
    %2 = vector.load %arg1[%c0_3, %c0_4] : memref<16x16xf32, #tpu.memory_space<vmem>>, vector<16x16xf32>
    %cst = arith.constant dense<0.000000e+00> : vector<16x128xf32>
    %3 = tpu.matmul %2, %0, %cst {dimension_numbers = #tpu.dot_dimension_numbers<[1], [0], [0], [1], [0, 0, 1, 1], [], []>} : vector<16x16xf32>, vector<16x128xf32>, vector<16x128xf32> -> vector<16x128xf32>
    %4 = vector.broadcast %1 : vector<1x128xf32> to vector<16x128xf32>
    %5 = arith.addf %3, %4 : vector<16x128xf32>
    %6 = vector.extract_strided_slice %5 {offsets = [0, 0], sizes = [2, 128], strides = [1, 1]} : vector<16x128xf32> to vector<2x128xf32>
    %7 = vector.extract_strided_slice %5 {offsets = [2, 0], sizes = [2, 128], strides = [1, 1]} : vector<16x128xf32> to vector<2x128xf32>
    %8 = vector.extract_strided_slice %5 {offsets = [4, 0], sizes = [2, 128], strides = [1, 1]} : vector<16x128xf32> to vector<2x128xf32>
    %9 = vector.extract_strided_slice %5 {offsets = [6, 0], sizes = [2, 128], strides = [1, 1]} : vector<16x128xf32> to vector<2x128xf32>
    %10 = vector.extract_strided_slice %5 {offsets = [8, 0], sizes = [2, 128], strides = [1, 1]} : vector<16x128xf32> to vector<2x128xf32>
    %11 = vector.extract_strided_slice %5 {offsets = [10, 0], sizes = [2, 128], strides = [1, 1]} : vector<16x128xf32> to vector<2x128xf32>
    %12 = vector.extract_strided_slice %5 {offsets = [12, 0], sizes = [2, 128], strides = [1, 1]} : vector<16x128xf32> to vector<2x128xf32>
    %13 = vector.extract_strided_slice %5 {offsets = [14, 0], sizes = [2, 128], strides = [1, 1]} : vector<16x128xf32> to vector<2x128xf32>
    %c0_5 = arith.constant 0 : index
    %c0_6 = arith.constant 0 : index
    %14 = vector.load %arg3[%c0_5, %c0_6] : memref<32x128xbf16, #tpu.memory_space<vmem>>, vector<32x128xbf16>
    %c0_7 = arith.constant 0 : index
    %c0_8 = arith.constant 0 : index
    %15 = vector.load %arg6[%c0_7, %c0_8] : memref<32x128xbf16, #tpu.memory_space<vmem>>, vector<32x128xbf16>
    %c0_9 = arith.constant 0 : index
    %c0_10 = arith.constant 0 : index
    %16 = vector.load %arg5[%c0_9, %c0_10] : memref<32x128xbf16, #tpu.memory_space<vmem>>, vector<32x128xbf16>
    %c0_11 = arith.constant 0 : index
    %c0_12 = arith.constant 0 : index
    %17 = vector.load %arg7[%c0_11, %c0_12] : memref<1x128xf32, #tpu.memory_space<vmem>>, vector<1x128xf32>
    %18 = arith.negf %6 : vector<2x128xf32>
    %19 = math.exp %18 : vector<2x128xf32>
    %cst_13 = arith.constant 1.000000e+00 : f32
    %20 = vector.broadcast %cst_13 : f32 to vector<2x128xf32>
    %21 = arith.addf %20, %19 : vector<2x128xf32>
    %22 = arith.divf %20, %21 : vector<2x128xf32>
    %23 = vector.extract_strided_slice %6 {offsets = [0, 64], sizes = [2, 32], strides = [1, 1]} : vector<2x128xf32> to vector<2x32xf32>
    %24 = math.tanh %23 : vector<2x32xf32>
    %25 = vector.extract_strided_slice %22 {offsets = [0, 0], sizes = [2, 32], strides = [1, 1]} : vector<2x128xf32> to vector<2x32xf32>
    %26 = vector.extract_strided_slice %22 {offsets = [0, 96], sizes = [2, 32], strides = [1, 1]} : vector<2x128xf32> to vector<2x32xf32>
    %27 = arith.mulf %25, %24 : vector<2x32xf32>
    %28 = math.tanh %27 : vector<2x32xf32>
    %29 = arith.mulf %26, %28 : vector<2x32xf32>
    %30 = arith.truncf %29 : vector<2x32xf32> to vector<2x32xbf16>
    %cst_14 = arith.constant dense<0.000000e+00> : vector<2x128xf32>
    %31 = tpu.matmul %30, %16, %cst_14 {dimension_numbers = #tpu.dot_dimension_numbers<[1], [0], [0], [1], [0, 0, 1, 1], [], []>} : vector<2x32xbf16>, vector<32x128xbf16>, vector<2x128xf32> -> vector<2x128xf32>
    %32 = vector.broadcast %17 : vector<1x128xf32> to vector<2x128xf32>
    %33 = arith.addf %31, %32 : vector<2x128xf32>
    %34 = arith.negf %33 : vector<2x128xf32>
    %35 = math.exp %34 : vector<2x128xf32>
    %cst_15 = arith.constant 1.000000e+00 : f32
    %36 = vector.broadcast %cst_15 : f32 to vector<2x128xf32>
    %37 = arith.addf %36, %35 : vector<2x128xf32>
    %38 = arith.divf %36, %37 : vector<2x128xf32>
    %39 = vector.extract_strided_slice %33 {offsets = [0, 64], sizes = [2, 32], strides = [1, 1]} : vector<2x128xf32> to vector<2x32xf32>
    %40 = math.tanh %39 : vector<2x32xf32>
    %41 = vector.extract_strided_slice %38 {offsets = [0, 0], sizes = [2, 32], strides = [1, 1]} : vector<2x128xf32> to vector<2x32xf32>
    %42 = vector.extract_strided_slice %38 {offsets = [0, 96], sizes = [2, 32], strides = [1, 1]} : vector<2x128xf32> to vector<2x32xf32>
    %43 = arith.mulf %41, %40 : vector<2x32xf32>
    %44 = math.tanh %43 : vector<2x32xf32>
    %45 = arith.mulf %42, %44 : vector<2x32xf32>
    %46 = arith.truncf %45 : vector<2x32xf32> to vector<2x32xbf16>
    %c0_16 = arith.constant 0 : index
    %c0_17 = arith.constant 0 : index
    %47 = vector.load %arg26[%c0_16, %c0_17] : memref<16x32xf32, #tpu.memory_space<vmem>>, vector<2x32xf32>
    tpu.vector_store %arg26[%c0_16, %c0_17], %45 {strides = array<i32>} : memref<16x32xf32, #tpu.memory_space<vmem>>, vector<2x32xf32>,
    %cst_18 = arith.constant dense<0.000000e+00> : vector<2x128xf32>
    %48 = tpu.matmul %30, %14, %cst_18 {dimension_numbers = #tpu.dot_dimension_numbers<[1], [0], [0], [1], [0, 0, 1, 1], [], []>} : vector<2x32xbf16>, vector<32x128xbf16>, vector<2x128xf32> -> vector<2x128xf32>
    %49 = arith.addf %7, %48 : vector<2x128xf32>
    %50 = arith.negf %49 : vector<2x128xf32>
    %51 = math.exp %50 : vector<2x128xf32>
    %cst_19 = arith.constant 1.000000e+00 : f32
    %52 = vector.broadcast %cst_19 : f32 to vector<2x128xf32>
    %53 = arith.addf %52, %51 : vector<2x128xf32>
    %54 = arith.divf %52, %53 : vector<2x128xf32>
    %55 = vector.extract_strided_slice %49 {offsets = [0, 64], sizes = [2, 32], strides = [1, 1]} : vector<2x128xf32> to vector<2x32xf32>
    %56 = math.tanh %55 : vector<2x32xf32>
    %57 = vector.extract_strided_slice %54 {offsets = [0, 0], sizes = [2, 32], strides = [1, 1]} : vector<2x128xf32> to vector<2x32xf32>
    %58 = vector.extract_strided_slice %54 {offsets = [0, 32], sizes = [2, 32], strides = [1, 1]} : vector<2x128xf32> to vector<2x32xf32>
    %59 = vector.extract_strided_slice %54 {offsets = [0, 96], sizes = [2, 32], strides = [1, 1]} : vector<2x128xf32> to vector<2x32xf32>
    %60 = arith.mulf %58, %27 : vector<2x32xf32>
    %61 = arith.mulf %57, %56 : vector<2x32xf32>
    %62 = arith.addf %60, %61 : vector<2x32xf32>
    %63 = math.tanh %62 : vector<2x32xf32>
    %64 = arith.mulf %59, %63 : vector<2x32xf32>
    %65 = arith.truncf %64 : vector<2x32xf32> to vector<2x32xbf16>
    %cst_20 = arith.constant dense<0.000000e+00> : vector<2x128xf32>
    %66 = tpu.matmul %65, %16, %cst_20 {dimension_numbers = #tpu.dot_dimension_numbers<[1], [0], [0], [1], [0, 0, 1, 1], [], []>} : vector<2x32xbf16>, vector<32x128xbf16>, vector<2x128xf32> -> vector<2x128xf32>
    %67 = vector.broadcast %17 : vector<1x128xf32> to vector<2x128xf32>
    %68 = arith.addf %66, %67 : vector<2x128xf32>
    %cst_21 = arith.constant dense<0.000000e+00> : vector<2x128xf32>
    %69 = tpu.matmul %46, %15, %cst_21 {dimension_numbers = #tpu.dot_dimension_numbers<[1], [0], [0], [1], [0, 0, 1, 1], [], []>} : vector<2x32xbf16>, vector<32x128xbf16>, vector<2x128xf32> -> vector<2x128xf32>
    %70 = arith.addf %68, %69 : vector<2x128xf32>
    %71 = arith.negf %70 : vector<2x128xf32>
    %72 = math.exp %71 : vector<2x128xf32>
    %cst_22 = arith.constant 1.000000e+00 : f32
    %73 = vector.broadcast %cst_22 : f32 to vector<2x128xf32>
    %74 = arith.addf %73, %72 : vector<2x128xf32>
    %75 = arith.divf %73, %74 : vector<2x128xf32>
    %76 = vector.extract_strided_slice %70 {offsets = [0, 64], sizes = [2, 32], strides = [1, 1]} : vector<2x128xf32> to vector<2x32xf32>
    %77 = math.tanh %76 : vector<2x32xf32>
    %78 = vector.extract_strided_slice %75 {offsets = [0, 0], sizes = [2, 32], strides = [1, 1]} : vector<2x128xf32> to vector<2x32xf32>
    %79 = vector.extract_strided_slice %75 {offsets = [0, 32], sizes = [2, 32], strides = [1, 1]} : vector<2x128xf32> to vector<2x32xf32>
    %80 = vector.extract_strided_slice %75 {offsets = [0, 96], sizes = [2, 32], strides = [1, 1]} : vector<2x128xf32> to vector<2x32xf32>
    %81 = arith.mulf %79, %43 : vector<2x32xf32>
    %82 = arith.mulf %78, %77 : vector<2x32xf32>
    %83 = arith.addf %81, %82 : vector<2x32xf32>
    %84 = math.tanh %83 : vector<2x32xf32>
    %85 = arith.mulf %80, %84 : vector<2x32xf32>
    %86 = arith.truncf %85 : vector<2x32xf32> to vector<2x32xbf16>
    %c2 = arith.constant 2 : index
    %c0_23 = arith.constant 0 : index
    %87 = vector.load %arg26[%c2, %c0_23] : memref<16x32xf32, #tpu.memory_space<vmem>>, vector<2x32xf32>
    tpu.vector_store %arg26[%c2, %c0_23], %85 {strides = array<i32>} : memref<16x32xf32, #tpu.memory_space<vmem>>, vector<2x32xf32>,
    %cst_24 = arith.constant dense<0.000000e+00> : vector<2x128xf32>
    %88 = tpu.matmul %65, %14, %cst_24 {dimension_numbers = #tpu.dot_dimension_numbers<[1], [0], [0], [1], [0, 0, 1, 1], [], []>} : vector<2x32xbf16>, vector<32x128xbf16>, vector<2x128xf32> -> vector<2x128xf32>
    %89 = arith.addf %8, %88 : vector<2x128xf32>
    %90 = arith.negf %89 : vector<2x128xf32>
    %91 = math.exp %90 : vector<2x128xf32>
    %cst_25 = arith.constant 1.000000e+00 : f32
    %92 = vector.broadcast %cst_25 : f32 to vector<2x128xf32>
    %93 = arith.addf %92, %91 : vector<2x128xf32>
    %94 = arith.divf %92, %93 : vector<2x128xf32>
    %95 = vector.extract_strided_slice %89 {offsets = [0, 64], sizes = [2, 32], strides = [1, 1]} : vector<2x128xf32> to vector<2x32xf32>
    %96 = math.tanh %95 : vector<2x32xf32>
    %97 = vector.extract_strided_slice %94 {offsets = [0, 0], sizes = [2, 32], strides = [1, 1]} : vector<2x128xf32> to vector<2x32xf32>
    %98 = vector.extract_strided_slice %94 {offsets = [0, 32], sizes = [2, 32], strides = [1, 1]} : vector<2x128xf32> to vector<2x32xf32>
    %99 = vector.extract_strided_slice %94 {offsets = [0, 96], sizes = [2, 32], strides = [1, 1]} : vector<2x128xf32> to vector<2x32xf32>
    %100 = arith.mulf %98, %62 : vector<2x32xf32>
    %101 = arith.mulf %97, %96 : vector<2x32xf32>
    %102 = arith.addf %100, %101 : vector<2x32xf32>
    %103 = math.tanh %102 : vector<2x32xf32>
    %104 = arith.mulf %99, %103 : vector<2x32xf32>
    %105 = arith.truncf %104 : vector<2x32xf32> to vector<2x32xbf16>
    %cst_26 = arith.constant dense<0.000000e+00> : vector<2x128xf32>
    %106 = tpu.matmul %105, %16, %cst_26 {dimension_numbers = #tpu.dot_dimension_numbers<[1], [0], [0], [1], [0, 0, 1, 1], [], []>} : vector<2x32xbf16>, vector<32x128xbf16>, vector<2x128xf32> -> vector<2x128xf32>
    %107 = vector.broadcast %17 : vector<1x128xf32> to vector<2x128xf32>
    %108 = arith.addf %106, %107 : vector<2x128xf32>
    %cst_27 = arith.constant dense<0.000000e+00> : vector<2x128xf32>
    %109 = tpu.matmul %86, %15, %cst_27 {dimension_numbers = #tpu.dot_dimension_numbers<[1], [0], [0], [1], [0, 0, 1, 1], [], []>} : vector<2x32xbf16>, vector<32x128xbf16>, vector<2x128xf32> -> vector<2x128xf32>
    %110 = arith.addf %108, %109 : vector<2x128xf32>
    %111 = arith.negf %110 : vector<2x128xf32>
    %112 = math.exp %111 : vector<2x128xf32>
    %cst_28 = arith.constant 1.000000e+00 : f32
    %113 = vector.broadcast %cst_28 : f32 to vector<2x128xf32>
    %114 = arith.addf %113, %112 : vector<2x128xf32>
    %115 = arith.divf %113, %114 : vector<2x128xf32>
    %116 = vector.extract_strided_slice %110 {offsets = [0, 64], sizes = [2, 32], strides = [1, 1]} : vector<2x128xf32> to vector<2x32xf32>
    %117 = math.tanh %116 : vector<2x32xf32>
    %118 = vector.extract_strided_slice %115 {offsets = [0, 0], sizes = [2, 32], strides = [1, 1]} : vector<2x128xf32> to vector<2x32xf32>
    %119 = vector.extract_strided_slice %115 {offsets = [0, 32], sizes = [2, 32], strides = [1, 1]} : vector<2x128xf32> to vector<2x32xf32>
    %120 = vector.extract_strided_slice %115 {offsets = [0, 96], sizes = [2, 32], strides = [1, 1]} : vector<2x128xf32> to vector<2x32xf32>
    %121 = arith.mulf %119, %83 : vector<2x32xf32>
    %122 = arith.mulf %118, %117 : vector<2x32xf32>
    %123 = arith.addf %121, %122 : vector<2x32xf32>
    %124 = math.tanh %123 : vector<2x32xf32>
    %125 = arith.mulf %120, %124 : vector<2x32xf32>
    %126 = arith.truncf %125 : vector<2x32xf32> to vector<2x32xbf16>
    %c4 = arith.constant 4 : index
    %c0_29 = arith.constant 0 : index
    %127 = vector.load %arg26[%c4, %c0_29] : memref<16x32xf32, #tpu.memory_space<vmem>>, vector<2x32xf32>
    tpu.vector_store %arg26[%c4, %c0_29], %125 {strides = array<i32>} : memref<16x32xf32, #tpu.memory_space<vmem>>, vector<2x32xf32>,
    %cst_30 = arith.constant dense<0.000000e+00> : vector<2x128xf32>
    %128 = tpu.matmul %105, %14, %cst_30 {dimension_numbers = #tpu.dot_dimension_numbers<[1], [0], [0], [1], [0, 0, 1, 1], [], []>} : vector<2x32xbf16>, vector<32x128xbf16>, vector<2x128xf32> -> vector<2x128xf32>
    %129 = arith.addf %9, %128 : vector<2x128xf32>
    %130 = arith.negf %129 : vector<2x128xf32>
    %131 = math.exp %130 : vector<2x128xf32>
    %cst_31 = arith.constant 1.000000e+00 : f32
    %132 = vector.broadcast %cst_31 : f32 to vector<2x128xf32>
    %133 = arith.addf %132, %131 : vector<2x128xf32>
    %134 = arith.divf %132, %133 : vector<2x128xf32>
    %135 = vector.extract_strided_slice %129 {offsets = [0, 64], sizes = [2, 32], strides = [1, 1]} : vector<2x128xf32> to vector<2x32xf32>
    %136 = math.tanh %135 : vector<2x32xf32>
    %137 = vector.extract_strided_slice %134 {offsets = [0, 0], sizes = [2, 32], strides = [1, 1]} : vector<2x128xf32> to vector<2x32xf32>
    %138 = vector.extract_strided_slice %134 {offsets = [0, 32], sizes = [2, 32], strides = [1, 1]} : vector<2x128xf32> to vector<2x32xf32>
    %139 = vector.extract_strided_slice %134 {offsets = [0, 96], sizes = [2, 32], strides = [1, 1]} : vector<2x128xf32> to vector<2x32xf32>
    %140 = arith.mulf %138, %102 : vector<2x32xf32>
    %141 = arith.mulf %137, %136 : vector<2x32xf32>
    %142 = arith.addf %140, %141 : vector<2x32xf32>
    %143 = math.tanh %142 : vector<2x32xf32>
    %144 = arith.mulf %139, %143 : vector<2x32xf32>
    %145 = arith.truncf %144 : vector<2x32xf32> to vector<2x32xbf16>
    %cst_32 = arith.constant dense<0.000000e+00> : vector<2x128xf32>
    %146 = tpu.matmul %145, %16, %cst_32 {dimension_numbers = #tpu.dot_dimension_numbers<[1], [0], [0], [1], [0, 0, 1, 1], [], []>} : vector<2x32xbf16>, vector<32x128xbf16>, vector<2x128xf32> -> vector<2x128xf32>
    %147 = vector.broadcast %17 : vector<1x128xf32> to vector<2x128xf32>
    %148 = arith.addf %146, %147 : vector<2x128xf32>
    %cst_33 = arith.constant dense<0.000000e+00> : vector<2x128xf32>
    %149 = tpu.matmul %126, %15, %cst_33 {dimension_numbers = #tpu.dot_dimension_numbers<[1], [0], [0], [1], [0, 0, 1, 1], [], []>} : vector<2x32xbf16>, vector<32x128xbf16>, vector<2x128xf32> -> vector<2x128xf32>
    %150 = arith.addf %148, %149 : vector<2x128xf32>
    %151 = arith.negf %150 : vector<2x128xf32>
    %152 = math.exp %151 : vector<2x128xf32>
    %cst_34 = arith.constant 1.000000e+00 : f32
    %153 = vector.broadcast %cst_34 : f32 to vector<2x128xf32>
    %154 = arith.addf %153, %152 : vector<2x128xf32>
    %155 = arith.divf %153, %154 : vector<2x128xf32>
    %156 = vector.extract_strided_slice %150 {offsets = [0, 64], sizes = [2, 32], strides = [1, 1]} : vector<2x128xf32> to vector<2x32xf32>
    %157 = math.tanh %156 : vector<2x32xf32>
    %158 = vector.extract_strided_slice %155 {offsets = [0, 0], sizes = [2, 32], strides = [1, 1]} : vector<2x128xf32> to vector<2x32xf32>
    %159 = vector.extract_strided_slice %155 {offsets = [0, 32], sizes = [2, 32], strides = [1, 1]} : vector<2x128xf32> to vector<2x32xf32>
    %160 = vector.extract_strided_slice %155 {offsets = [0, 96], sizes = [2, 32], strides = [1, 1]} : vector<2x128xf32> to vector<2x32xf32>
    %161 = arith.mulf %159, %123 : vector<2x32xf32>
    %162 = arith.mulf %158, %157 : vector<2x32xf32>
    %163 = arith.addf %161, %162 : vector<2x32xf32>
    %164 = math.tanh %163 : vector<2x32xf32>
    %165 = arith.mulf %160, %164 : vector<2x32xf32>
    %166 = arith.truncf %165 : vector<2x32xf32> to vector<2x32xbf16>
    %c6 = arith.constant 6 : index
    %c0_35 = arith.constant 0 : index
    %167 = vector.load %arg26[%c6, %c0_35] : memref<16x32xf32, #tpu.memory_space<vmem>>, vector<2x32xf32>
    tpu.vector_store %arg26[%c6, %c0_35], %165 {strides = array<i32>} : memref<16x32xf32, #tpu.memory_space<vmem>>, vector<2x32xf32>,
    %cst_36 = arith.constant dense<0.000000e+00> : vector<2x128xf32>
    %168 = tpu.matmul %145, %14, %cst_36 {dimension_numbers = #tpu.dot_dimension_numbers<[1], [0], [0], [1], [0, 0, 1, 1], [], []>} : vector<2x32xbf16>, vector<32x128xbf16>, vector<2x128xf32> -> vector<2x128xf32>
    %169 = arith.addf %10, %168 : vector<2x128xf32>
    %170 = arith.negf %169 : vector<2x128xf32>
    %171 = math.exp %170 : vector<2x128xf32>
    %cst_37 = arith.constant 1.000000e+00 : f32
    %172 = vector.broadcast %cst_37 : f32 to vector<2x128xf32>
    %173 = arith.addf %172, %171 : vector<2x128xf32>
    %174 = arith.divf %172, %173 : vector<2x128xf32>
    %175 = vector.extract_strided_slice %169 {offsets = [0, 64], sizes = [2, 32], strides = [1, 1]} : vector<2x128xf32> to vector<2x32xf32>
    %176 = math.tanh %175 : vector<2x32xf32>
    %177 = vector.extract_strided_slice %174 {offsets = [0, 0], sizes = [2, 32], strides = [1, 1]} : vector<2x128xf32> to vector<2x32xf32>
    %178 = vector.extract_strided_slice %174 {offsets = [0, 32], sizes = [2, 32], strides = [1, 1]} : vector<2x128xf32> to vector<2x32xf32>
    %179 = vector.extract_strided_slice %174 {offsets = [0, 96], sizes = [2, 32], strides = [1, 1]} : vector<2x128xf32> to vector<2x32xf32>
    %180 = arith.mulf %178, %142 : vector<2x32xf32>
    %181 = arith.mulf %177, %176 : vector<2x32xf32>
    %182 = arith.addf %180, %181 : vector<2x32xf32>
    %183 = math.tanh %182 : vector<2x32xf32>
    %184 = arith.mulf %179, %183 : vector<2x32xf32>
    %185 = arith.truncf %184 : vector<2x32xf32> to vector<2x32xbf16>
    %cst_38 = arith.constant dense<0.000000e+00> : vector<2x128xf32>
    %186 = tpu.matmul %185, %16, %cst_38 {dimension_numbers = #tpu.dot_dimension_numbers<[1], [0], [0], [1], [0, 0, 1, 1], [], []>} : vector<2x32xbf16>, vector<32x128xbf16>, vector<2x128xf32> -> vector<2x128xf32>
    %187 = vector.broadcast %17 : vector<1x128xf32> to vector<2x128xf32>
    %188 = arith.addf %186, %187 : vector<2x128xf32>
    %cst_39 = arith.constant dense<0.000000e+00> : vector<2x128xf32>
    %189 = tpu.matmul %166, %15, %cst_39 {dimension_numbers = #tpu.dot_dimension_numbers<[1], [0], [0], [1], [0, 0, 1, 1], [], []>} : vector<2x32xbf16>, vector<32x128xbf16>, vector<2x128xf32> -> vector<2x128xf32>
    %190 = arith.addf %188, %189 : vector<2x128xf32>
    %191 = arith.negf %190 : vector<2x128xf32>
    %192 = math.exp %191 : vector<2x128xf32>
    %cst_40 = arith.constant 1.000000e+00 : f32
    %193 = vector.broadcast %cst_40 : f32 to vector<2x128xf32>
    %194 = arith.addf %193, %192 : vector<2x128xf32>
    %195 = arith.divf %193, %194 : vector<2x128xf32>
    %196 = vector.extract_strided_slice %190 {offsets = [0, 64], sizes = [2, 32], strides = [1, 1]} : vector<2x128xf32> to vector<2x32xf32>
    %197 = math.tanh %196 : vector<2x32xf32>
    %198 = vector.extract_strided_slice %195 {offsets = [0, 0], sizes = [2, 32], strides = [1, 1]} : vector<2x128xf32> to vector<2x32xf32>
    %199 = vector.extract_strided_slice %195 {offsets = [0, 32], sizes = [2, 32], strides = [1, 1]} : vector<2x128xf32> to vector<2x32xf32>
    %200 = vector.extract_strided_slice %195 {offsets = [0, 96], sizes = [2, 32], strides = [1, 1]} : vector<2x128xf32> to vector<2x32xf32>
    %201 = arith.mulf %199, %163 : vector<2x32xf32>
    %202 = arith.mulf %198, %197 : vector<2x32xf32>
    %203 = arith.addf %201, %202 : vector<2x32xf32>
    %204 = math.tanh %203 : vector<2x32xf32>
    %205 = arith.mulf %200, %204 : vector<2x32xf32>
    %206 = arith.truncf %205 : vector<2x32xf32> to vector<2x32xbf16>
    %c8 = arith.constant 8 : index
    %c0_41 = arith.constant 0 : index
    %207 = vector.load %arg26[%c8, %c0_41] : memref<16x32xf32, #tpu.memory_space<vmem>>, vector<2x32xf32>
    tpu.vector_store %arg26[%c8, %c0_41], %205 {strides = array<i32>} : memref<16x32xf32, #tpu.memory_space<vmem>>, vector<2x32xf32>,
    %cst_42 = arith.constant dense<0.000000e+00> : vector<2x128xf32>
    %208 = tpu.matmul %185, %14, %cst_42 {dimension_numbers = #tpu.dot_dimension_numbers<[1], [0], [0], [1], [0, 0, 1, 1], [], []>} : vector<2x32xbf16>, vector<32x128xbf16>, vector<2x128xf32> -> vector<2x128xf32>
    %209 = arith.addf %11, %208 : vector<2x128xf32>
    %210 = arith.negf %209 : vector<2x128xf32>
    %211 = math.exp %210 : vector<2x128xf32>
    %cst_43 = arith.constant 1.000000e+00 : f32
    %212 = vector.broadcast %cst_43 : f32 to vector<2x128xf32>
    %213 = arith.addf %212, %211 : vector<2x128xf32>
    %214 = arith.divf %212, %213 : vector<2x128xf32>
    %215 = vector.extract_strided_slice %209 {offsets = [0, 64], sizes = [2, 32], strides = [1, 1]} : vector<2x128xf32> to vector<2x32xf32>
    %216 = math.tanh %215 : vector<2x32xf32>
    %217 = vector.extract_strided_slice %214 {offsets = [0, 0], sizes = [2, 32], strides = [1, 1]} : vector<2x128xf32> to vector<2x32xf32>
    %218 = vector.extract_strided_slice %214 {offsets = [0, 32], sizes = [2, 32], strides = [1, 1]} : vector<2x128xf32> to vector<2x32xf32>
    %219 = vector.extract_strided_slice %214 {offsets = [0, 96], sizes = [2, 32], strides = [1, 1]} : vector<2x128xf32> to vector<2x32xf32>
    %220 = arith.mulf %218, %182 : vector<2x32xf32>
    %221 = arith.mulf %217, %216 : vector<2x32xf32>
    %222 = arith.addf %220, %221 : vector<2x32xf32>
    %223 = math.tanh %222 : vector<2x32xf32>
    %224 = arith.mulf %219, %223 : vector<2x32xf32>
    %225 = arith.truncf %224 : vector<2x32xf32> to vector<2x32xbf16>
    %cst_44 = arith.constant dense<0.000000e+00> : vector<2x128xf32>
    %226 = tpu.matmul %225, %16, %cst_44 {dimension_numbers = #tpu.dot_dimension_numbers<[1], [0], [0], [1], [0, 0, 1, 1], [], []>} : vector<2x32xbf16>, vector<32x128xbf16>, vector<2x128xf32> -> vector<2x128xf32>
    %227 = vector.broadcast %17 : vector<1x128xf32> to vector<2x128xf32>
    %228 = arith.addf %226, %227 : vector<2x128xf32>
    %cst_45 = arith.constant dense<0.000000e+00> : vector<2x128xf32>
    %229 = tpu.matmul %206, %15, %cst_45 {dimension_numbers = #tpu.dot_dimension_numbers<[1], [0], [0], [1], [0, 0, 1, 1], [], []>} : vector<2x32xbf16>, vector<32x128xbf16>, vector<2x128xf32> -> vector<2x128xf32>
    %230 = arith.addf %228, %229 : vector<2x128xf32>
    %231 = arith.negf %230 : vector<2x128xf32>
    %232 = math.exp %231 : vector<2x128xf32>
    %cst_46 = arith.constant 1.000000e+00 : f32
    %233 = vector.broadcast %cst_46 : f32 to vector<2x128xf32>
    %234 = arith.addf %233, %232 : vector<2x128xf32>
    %235 = arith.divf %233, %234 : vector<2x128xf32>
    %236 = vector.extract_strided_slice %230 {offsets = [0, 64], sizes = [2, 32], strides = [1, 1]} : vector<2x128xf32> to vector<2x32xf32>
    %237 = math.tanh %236 : vector<2x32xf32>
    %238 = vector.extract_strided_slice %235 {offsets = [0, 0], sizes = [2, 32], strides = [1, 1]} : vector<2x128xf32> to vector<2x32xf32>
    %239 = vector.extract_strided_slice %235 {offsets = [0, 32], sizes = [2, 32], strides = [1, 1]} : vector<2x128xf32> to vector<2x32xf32>
    %240 = vector.extract_strided_slice %235 {offsets = [0, 96], sizes = [2, 32], strides = [1, 1]} : vector<2x128xf32> to vector<2x32xf32>
    %241 = arith.mulf %239, %203 : vector<2x32xf32>
    %242 = arith.mulf %238, %237 : vector<2x32xf32>
    %243 = arith.addf %241, %242 : vector<2x32xf32>
    %244 = math.tanh %243 : vector<2x32xf32>
    %245 = arith.mulf %240, %244 : vector<2x32xf32>
    %246 = arith.truncf %245 : vector<2x32xf32> to vector<2x32xbf16>
    %c10 = arith.constant 10 : index
    %c0_47 = arith.constant 0 : index
    %247 = vector.load %arg26[%c10, %c0_47] : memref<16x32xf32, #tpu.memory_space<vmem>>, vector<2x32xf32>
    tpu.vector_store %arg26[%c10, %c0_47], %245 {strides = array<i32>} : memref<16x32xf32, #tpu.memory_space<vmem>>, vector<2x32xf32>,
    %cst_48 = arith.constant dense<0.000000e+00> : vector<2x128xf32>
    %248 = tpu.matmul %225, %14, %cst_48 {dimension_numbers = #tpu.dot_dimension_numbers<[1], [0], [0], [1], [0, 0, 1, 1], [], []>} : vector<2x32xbf16>, vector<32x128xbf16>, vector<2x128xf32> -> vector<2x128xf32>
    %249 = arith.addf %12, %248 : vector<2x128xf32>
    %250 = arith.negf %249 : vector<2x128xf32>
    %251 = math.exp %250 : vector<2x128xf32>
    %cst_49 = arith.constant 1.000000e+00 : f32
    %252 = vector.broadcast %cst_49 : f32 to vector<2x128xf32>
    %253 = arith.addf %252, %251 : vector<2x128xf32>
    %254 = arith.divf %252, %253 : vector<2x128xf32>
    %255 = vector.extract_strided_slice %249 {offsets = [0, 64], sizes = [2, 32], strides = [1, 1]} : vector<2x128xf32> to vector<2x32xf32>
    %256 = math.tanh %255 : vector<2x32xf32>
    %257 = vector.extract_strided_slice %254 {offsets = [0, 0], sizes = [2, 32], strides = [1, 1]} : vector<2x128xf32> to vector<2x32xf32>
    %258 = vector.extract_strided_slice %254 {offsets = [0, 32], sizes = [2, 32], strides = [1, 1]} : vector<2x128xf32> to vector<2x32xf32>
    %259 = vector.extract_strided_slice %254 {offsets = [0, 96], sizes = [2, 32], strides = [1, 1]} : vector<2x128xf32> to vector<2x32xf32>
    %260 = arith.mulf %258, %222 : vector<2x32xf32>
    %261 = arith.mulf %257, %256 : vector<2x32xf32>
    %262 = arith.addf %260, %261 : vector<2x32xf32>
    %263 = math.tanh %262 : vector<2x32xf32>
    %264 = arith.mulf %259, %263 : vector<2x32xf32>
    %265 = arith.truncf %264 : vector<2x32xf32> to vector<2x32xbf16>
    %cst_50 = arith.constant dense<0.000000e+00> : vector<2x128xf32>
    %266 = tpu.matmul %265, %16, %cst_50 {dimension_numbers = #tpu.dot_dimension_numbers<[1], [0], [0], [1], [0, 0, 1, 1], [], []>} : vector<2x32xbf16>, vector<32x128xbf16>, vector<2x128xf32> -> vector<2x128xf32>
    %267 = vector.broadcast %17 : vector<1x128xf32> to vector<2x128xf32>
    %268 = arith.addf %266, %267 : vector<2x128xf32>
    %cst_51 = arith.constant dense<0.000000e+00> : vector<2x128xf32>
    %269 = tpu.matmul %246, %15, %cst_51 {dimension_numbers = #tpu.dot_dimension_numbers<[1], [0], [0], [1], [0, 0, 1, 1], [], []>} : vector<2x32xbf16>, vector<32x128xbf16>, vector<2x128xf32> -> vector<2x128xf32>
    %270 = arith.addf %268, %269 : vector<2x128xf32>
    %271 = arith.negf %270 : vector<2x128xf32>
    %272 = math.exp %271 : vector<2x128xf32>
    %cst_52 = arith.constant 1.000000e+00 : f32
    %273 = vector.broadcast %cst_52 : f32 to vector<2x128xf32>
    %274 = arith.addf %273, %272 : vector<2x128xf32>
    %275 = arith.divf %273, %274 : vector<2x128xf32>
    %276 = vector.extract_strided_slice %270 {offsets = [0, 64], sizes = [2, 32], strides = [1, 1]} : vector<2x128xf32> to vector<2x32xf32>
    %277 = math.tanh %276 : vector<2x32xf32>
    %278 = vector.extract_strided_slice %275 {offsets = [0, 0], sizes = [2, 32], strides = [1, 1]} : vector<2x128xf32> to vector<2x32xf32>
    %279 = vector.extract_strided_slice %275 {offsets = [0, 32], sizes = [2, 32], strides = [1, 1]} : vector<2x128xf32> to vector<2x32xf32>
    %280 = vector.extract_strided_slice %275 {offsets = [0, 96], sizes = [2, 32], strides = [1, 1]} : vector<2x128xf32> to vector<2x32xf32>
    %281 = arith.mulf %279, %243 : vector<2x32xf32>
    %282 = arith.mulf %278, %277 : vector<2x32xf32>
    %283 = arith.addf %281, %282 : vector<2x32xf32>
    %284 = math.tanh %283 : vector<2x32xf32>
    %285 = arith.mulf %280, %284 : vector<2x32xf32>
    %286 = arith.truncf %285 : vector<2x32xf32> to vector<2x32xbf16>
    %c12 = arith.constant 12 : index
    %c0_53 = arith.constant 0 : index
    %287 = vector.load %arg26[%c12, %c0_53] : memref<16x32xf32, #tpu.memory_space<vmem>>, vector<2x32xf32>
    tpu.vector_store %arg26[%c12, %c0_53], %285 {strides = array<i32>} : memref<16x32xf32, #tpu.memory_space<vmem>>, vector<2x32xf32>,
    %cst_54 = arith.constant dense<0.000000e+00> : vector<2x128xf32>
    %288 = tpu.matmul %265, %14, %cst_54 {dimension_numbers = #tpu.dot_dimension_numbers<[1], [0], [0], [1], [0, 0, 1, 1], [], []>} : vector<2x32xbf16>, vector<32x128xbf16>, vector<2x128xf32> -> vector<2x128xf32>
    %289 = arith.addf %13, %288 : vector<2x128xf32>
    %290 = arith.negf %289 : vector<2x128xf32>
    %291 = math.exp %290 : vector<2x128xf32>
    %cst_55 = arith.constant 1.000000e+00 : f32
    %292 = vector.broadcast %cst_55 : f32 to vector<2x128xf32>
    %293 = arith.addf %292, %291 : vector<2x128xf32>
    %294 = arith.divf %292, %293 : vector<2x128xf32>
    %295 = vector.extract_strided_slice %289 {offsets = [0, 64], sizes = [2, 32], strides = [1, 1]} : vector<2x128xf32> to vector<2x32xf32>
    %296 = math.tanh %295 : vector<2x32xf32>
    %297 = vector.extract_strided_slice %294 {offsets = [0, 0], sizes = [2, 32], strides = [1, 1]} : vector<2x128xf32> to vector<2x32xf32>
    %298 = vector.extract_strided_slice %294 {offsets = [0, 32], sizes = [2, 32], strides = [1, 1]} : vector<2x128xf32> to vector<2x32xf32>
    %299 = vector.extract_strided_slice %294 {offsets = [0, 96], sizes = [2, 32], strides = [1, 1]} : vector<2x128xf32> to vector<2x32xf32>
    %300 = arith.mulf %298, %262 : vector<2x32xf32>
    %301 = arith.mulf %297, %296 : vector<2x32xf32>
    %302 = arith.addf %300, %301 : vector<2x32xf32>
    %303 = math.tanh %302 : vector<2x32xf32>
    %304 = arith.mulf %299, %303 : vector<2x32xf32>
    %305 = arith.truncf %304 : vector<2x32xf32> to vector<2x32xbf16>
    %cst_56 = arith.constant dense<0.000000e+00> : vector<2x128xf32>
    %306 = tpu.matmul %305, %16, %cst_56 {dimension_numbers = #tpu.dot_dimension_numbers<[1], [0], [0], [1], [0, 0, 1, 1], [], []>} : vector<2x32xbf16>, vector<32x128xbf16>, vector<2x128xf32> -> vector<2x128xf32>
    %307 = vector.broadcast %17 : vector<1x128xf32> to vector<2x128xf32>
    %308 = arith.addf %306, %307 : vector<2x128xf32>
    %cst_57 = arith.constant dense<0.000000e+00> : vector<2x128xf32>
    %309 = tpu.matmul %286, %15, %cst_57 {dimension_numbers = #tpu.dot_dimension_numbers<[1], [0], [0], [1], [0, 0, 1, 1], [], []>} : vector<2x32xbf16>, vector<32x128xbf16>, vector<2x128xf32> -> vector<2x128xf32>
    %310 = arith.addf %308, %309 : vector<2x128xf32>
    %311 = arith.negf %310 : vector<2x128xf32>
    %312 = math.exp %311 : vector<2x128xf32>
    %cst_58 = arith.constant 1.000000e+00 : f32
    %313 = vector.broadcast %cst_58 : f32 to vector<2x128xf32>
    %314 = arith.addf %313, %312 : vector<2x128xf32>
    %315 = arith.divf %313, %314 : vector<2x128xf32>
    %316 = vector.extract_strided_slice %310 {offsets = [0, 64], sizes = [2, 32], strides = [1, 1]} : vector<2x128xf32> to vector<2x32xf32>
    %317 = math.tanh %316 : vector<2x32xf32>
    %318 = vector.extract_strided_slice %315 {offsets = [0, 0], sizes = [2, 32], strides = [1, 1]} : vector<2x128xf32> to vector<2x32xf32>
    %319 = vector.extract_strided_slice %315 {offsets = [0, 32], sizes = [2, 32], strides = [1, 1]} : vector<2x128xf32> to vector<2x32xf32>
    %320 = vector.extract_strided_slice %315 {offsets = [0, 96], sizes = [2, 32], strides = [1, 1]} : vector<2x128xf32> to vector<2x32xf32>
    %321 = arith.mulf %319, %283 : vector<2x32xf32>
    %322 = arith.mulf %318, %317 : vector<2x32xf32>
    %323 = arith.addf %321, %322 : vector<2x32xf32>
    %324 = math.tanh %323 : vector<2x32xf32>
    %325 = arith.mulf %320, %324 : vector<2x32xf32>
    %c14 = arith.constant 14 : index
    %c0_59 = arith.constant 0 : index
    %326 = vector.load %arg26[%c14, %c0_59] : memref<16x32xf32, #tpu.memory_space<vmem>>, vector<2x32xf32>
    tpu.vector_store %arg26[%c14, %c0_59], %325 {strides = array<i32>} : memref<16x32xf32, #tpu.memory_space<vmem>>, vector<2x32xf32>,
    %c0_60 = arith.constant 0 : index
    %c0_61 = arith.constant 0 : index
    %327 = vector.load %arg26[%c0_60, %c0_61] : memref<16x32xf32, #tpu.memory_space<vmem>>, vector<16x32xf32>
    %c0_62 = arith.constant 0 : index
    %c0_63 = arith.constant 0 : index
    %328 = vector.load %arg8[%c0_62, %c0_63] : memref<32x32xf32, #tpu.memory_space<vmem>>, vector<32x32xf32>
    %cst_64 = arith.constant dense<0.000000e+00> : vector<16x32xf32>
    %329 = tpu.matmul %327, %328, %cst_64 {dimension_numbers = #tpu.dot_dimension_numbers<[1], [0], [0], [1], [0, 0, 1, 1], [], []>} : vector<16x32xf32>, vector<32x32xf32>, vector<16x32xf32> -> vector<16x32xf32>
    %c0_65 = arith.constant 0 : index
    %c0_66 = arith.constant 0 : index
    %330 = vector.load %arg9[%c0_65, %c0_66] : memref<1x32xf32, #tpu.memory_space<vmem>>, vector<1x32xf32>
    %331 = vector.broadcast %330 : vector<1x32xf32> to vector<16x32xf32>
    %332 = arith.addf %329, %331 : vector<16x32xf32>
    %333 = math.tanh %332 : vector<16x32xf32>
    %c0_67 = arith.constant 0 : index
    %c0_68 = arith.constant 0 : index
    %334 = vector.load %arg12[%c0_67, %c0_68] : memref<16x16xf32, #tpu.memory_space<vmem>>, vector<16x16xf32>
    %335 = arith.mulf %333, %333 : vector<16x32xf32>
    %336 = tpu.concatenate %333, %335 in 1 : vector<16x32xf32>, vector<16x32xf32> -> vector<16x64xf32>
    %cst_69 = arith.constant dense<0.000000e+00> : vector<16x64xf32>
    %337 = tpu.matmul %334, %336, %cst_69 {dimension_numbers = #tpu.dot_dimension_numbers<[1], [0], [0], [1], [0, 0, 1, 1], [], []>} : vector<16x16xf32>, vector<16x64xf32>, vector<16x64xf32> -> vector<16x64xf32>
    %338 = vector.extract_strided_slice %337 {offsets = [0, 0], sizes = [16, 32], strides = [1, 1]} : vector<16x64xf32> to vector<16x32xf32>
    %cst_70 = arith.constant dense<0.000000e+00> : vector<16xf32>
    %339 = vector.multi_reduction <add>, %338, %cst_70 [1] : vector<16x32xf32> to vector<16xf32>
    %340 = vector.shape_cast %339 : vector<16xf32> to vector<16x1xf32>
    %341 = vector.extract_strided_slice %337 {offsets = [0, 32], sizes = [16, 32], strides = [1, 1]} : vector<16x64xf32> to vector<16x32xf32>
    %cst_71 = arith.constant dense<0.000000e+00> : vector<16xf32>
    %342 = vector.multi_reduction <add>, %341, %cst_71 [1] : vector<16x32xf32> to vector<16xf32>
    %343 = vector.shape_cast %342 : vector<16xf32> to vector<16x1xf32>
    %344 = arith.mulf %340, %340 : vector<16x1xf32>
    %345 = arith.subf %343, %344 : vector<16x1xf32>
    %cst_72 = arith.constant 0.000000e+00 : f32
    %346 = vector.broadcast %cst_72 : f32 to vector<16x1xf32>
    %347 = arith.maximumf %345, %346 : vector<16x1xf32>
    %cst_73 = arith.constant 9.99999974E-6 : f32
    %348 = vector.broadcast %cst_73 : f32 to vector<16x1xf32>
    %349 = arith.addf %347, %348 : vector<16x1xf32>
    %350 = math.rsqrt %349 : vector<16x1xf32>
    %c0_74 = arith.constant 0 : index
    %c0_75 = arith.constant 0 : index
    %351 = vector.load %arg10[%c0_74, %c0_75] : memref<16x1xf32, #tpu.memory_space<vmem>>, vector<16x1xf32>
    %352 = vector.broadcast %340 : vector<16x1xf32> to vector<16x32xf32>
    %353 = arith.subf %333, %352 : vector<16x32xf32>
    %354 = vector.broadcast %350 : vector<16x1xf32> to vector<16x32xf32>
    %355 = arith.mulf %353, %354 : vector<16x32xf32>
    %356 = vector.broadcast %351 : vector<16x1xf32> to vector<16x32xf32>
    %357 = arith.mulf %356, %355 : vector<16x32xf32>
    %c0_76 = arith.constant 0 : index
    %c0_77 = arith.constant 0 : index
    %358 = vector.load %arg11[%c0_76, %c0_77] : memref<16x1xf32, #tpu.memory_space<vmem>>, vector<16x1xf32>
    %359 = vector.broadcast %358 : vector<16x1xf32> to vector<16x32xf32>
    %360 = arith.addf %357, %359 : vector<16x32xf32>
    %c0_78 = arith.constant 0 : index
    %c0_79 = arith.constant 0 : index
    %361 = vector.load %arg14[%c0_78, %c0_79] : memref<1x32xf32, #tpu.memory_space<vmem>>, vector<1x32xf32>
    %362 = vector.broadcast %361 : vector<1x32xf32> to vector<16x32xf32>
    %363 = arith.mulf %360, %362 : vector<16x32xf32>
    %cst_80 = arith.constant dense<0.000000e+00> : vector<16xf32>
    %364 = vector.multi_reduction <add>, %363, %cst_80 [1] : vector<16x32xf32> to vector<16xf32>
    %365 = vector.shape_cast %364 : vector<16xf32> to vector<16x1xf32>
    %c0_81 = arith.constant 0 : index
    %c0_82 = arith.constant 0 : index
    %366 = vector.load %arg15[%c0_81, %c0_82] : memref<1x1xf32, #tpu.memory_space<vmem>>, vector<1x1xf32>
    %367 = vector.broadcast %366 : vector<1x1xf32> to vector<16x1xf32>
    %368 = arith.addf %365, %367 : vector<16x1xf32>
    %cst_83 = arith.constant dense<0xFF800000> : vector<1xf32>
    %369 = vector.multi_reduction <maximumf>, %368, %cst_83 [0] : vector<16x1xf32> to vector<1xf32>
    %370 = vector.shape_cast %369 : vector<1xf32> to vector<1x1xf32>
    %371 = vector.broadcast %370 : vector<1x1xf32> to vector<16x1xf32>
    %372 = arith.subf %368, %371 : vector<16x1xf32>
    %373 = math.exp %372 : vector<16x1xf32>
    %c0_84 = arith.constant 0 : index
    %c0_85 = arith.constant 0 : index
    %374 = vector.load %arg13[%c0_84, %c0_85] : memref<2x16xf32, #tpu.memory_space<vmem>>, vector<2x16xf32>
    %375 = vector.broadcast %373 : vector<16x1xf32> to vector<16x32xf32>
    %376 = arith.mulf %375, %360 : vector<16x32xf32>
    %377 = vector.shape_cast %373 : vector<16x1xf32> to vector<16x1xf32>
    %378 = vector.broadcast %377 : vector<16x1xf32> to vector<16x32xf32>
    %379 = tpu.concatenate %376, %378 in 1 : vector<16x32xf32>, vector<16x32xf32> -> vector<16x64xf32>
    %cst_86 = arith.constant dense<0.000000e+00> : vector<2x64xf32>
    %380 = tpu.matmul %374, %379, %cst_86 {dimension_numbers = #tpu.dot_dimension_numbers<[1], [0], [0], [1], [0, 0, 1, 1], [], []>} : vector<2x16xf32>, vector<16x64xf32>, vector<2x64xf32> -> vector<2x64xf32>
    %381 = vector.extract_strided_slice %380 {offsets = [0, 0], sizes = [2, 32], strides = [1, 1]} : vector<2x64xf32> to vector<2x32xf32>
    %382 = vector.extract_strided_slice %380 {offsets = [0, 32], sizes = [2, 32], strides = [1, 1]} : vector<2x64xf32> to vector<2x32xf32>
    %383 = tpu.reciprocal %382 {approx = true} : vector<2x32xf32> -> vector<2x32xf32>
    %384 = arith.mulf %381, %383 : vector<2x32xf32>
    %c0_87 = arith.constant 0 : index
    %c0_88 = arith.constant 0 : index
    %385 = vector.load %arg16[%c0_87, %c0_88] : memref<32x32xf32, #tpu.memory_space<vmem>>, vector<32x32xf32>
    %cst_89 = arith.constant dense<0.000000e+00> : vector<2x32xf32>
    %386 = tpu.matmul %384, %385, %cst_89 {dimension_numbers = #tpu.dot_dimension_numbers<[1], [0], [0], [1], [0, 0, 1, 1], [], []>} : vector<2x32xf32>, vector<32x32xf32>, vector<2x32xf32> -> vector<2x32xf32>
    %c0_90 = arith.constant 0 : index
    %c0_91 = arith.constant 0 : index
    %387 = vector.load %arg17[%c0_90, %c0_91] : memref<1x32xf32, #tpu.memory_space<vmem>>, vector<1x32xf32>
    %388 = vector.broadcast %387 : vector<1x32xf32> to vector<2x32xf32>
    %389 = arith.addf %386, %388 : vector<2x32xf32>
    %cst_92 = arith.constant 0.000000e+00 : f32
    %390 = vector.broadcast %cst_92 : f32 to vector<2x32xf32>
    %391 = arith.maximumf %389, %390 : vector<2x32xf32>
    %c0_93 = arith.constant 0 : index
    %c0_94 = arith.constant 0 : index
    %392 = vector.load %arg18[%c0_93, %c0_94] : memref<32x32xf32, #tpu.memory_space<vmem>>, vector<32x32xf32>
    %cst_95 = arith.constant dense<0.000000e+00> : vector<2x32xf32>
    %393 = tpu.matmul %391, %392, %cst_95 {dimension_numbers = #tpu.dot_dimension_numbers<[1], [0], [0], [1], [0, 0, 1, 1], [], []>} : vector<2x32xf32>, vector<32x32xf32>, vector<2x32xf32> -> vector<2x32xf32>
    %c0_96 = arith.constant 0 : index
    %c0_97 = arith.constant 0 : index
    %394 = vector.load %arg19[%c0_96, %c0_97] : memref<1x32xf32, #tpu.memory_space<vmem>>, vector<1x32xf32>
    %395 = vector.broadcast %394 : vector<1x32xf32> to vector<2x32xf32>
    %396 = arith.addf %393, %395 : vector<2x32xf32>
    %cst_98 = arith.constant 0.000000e+00 : f32
    %397 = vector.broadcast %cst_98 : f32 to vector<2x32xf32>
    %398 = arith.maximumf %396, %397 : vector<2x32xf32>
    %c0_99 = arith.constant 0 : index
    %c0_100 = arith.constant 0 : index
    %399 = vector.load %arg20[%c0_99, %c0_100] : memref<32x10xf32, #tpu.memory_space<vmem>>, vector<32x10xf32>
    %cst_101 = arith.constant dense<0.000000e+00> : vector<2x10xf32>
    %400 = tpu.matmul %398, %399, %cst_101 {dimension_numbers = #tpu.dot_dimension_numbers<[1], [0], [0], [1], [0, 0, 1, 1], [], []>} : vector<2x32xf32>, vector<32x10xf32>, vector<2x10xf32> -> vector<2x10xf32>
    %c0_102 = arith.constant 0 : index
    %c0_103 = arith.constant 0 : index
    %401 = vector.load %arg21[%c0_102, %c0_103] : memref<1x10xf32, #tpu.memory_space<vmem>>, vector<1x10xf32>
    %402 = vector.broadcast %401 : vector<1x10xf32> to vector<2x10xf32>
    %403 = arith.addf %400, %402 : vector<2x10xf32>
    %cst_104 = arith.constant dense<0xFF800000> : vector<2xf32>
    %404 = vector.multi_reduction <maximumf>, %403, %cst_104 [1] : vector<2x10xf32> to vector<2xf32>
    %405 = vector.shape_cast %404 : vector<2xf32> to vector<2x1xf32>
    %406 = vector.broadcast %405 : vector<2x1xf32> to vector<2x10xf32>
    %407 = arith.subf %403, %406 : vector<2x10xf32>
    %408 = math.exp %407 : vector<2x10xf32>
    %cst_105 = arith.constant dense<0.000000e+00> : vector<2xf32>
    %409 = vector.multi_reduction <add>, %408, %cst_105 [1] : vector<2x10xf32> to vector<2xf32>
    %410 = vector.shape_cast %409 : vector<2xf32> to vector<2x1xf32>
    %411 = tpu.reciprocal %410 {approx = true} : vector<2x1xf32> -> vector<2x1xf32>
    %412 = vector.broadcast %411 : vector<2x1xf32> to vector<2x10xf32>
    %413 = arith.mulf %408, %412 : vector<2x10xf32>
    %c0_106 = arith.constant 0 : index
    %c0_107 = arith.constant 0 : index
    %414 = vector.load %arg22[%c0_106, %c0_107] : memref<2x10xf32, #tpu.memory_space<vmem>>, vector<2x10xf32>
    tpu.vector_store %arg22[%c0_106, %c0_107], %413 {strides = array<i32>} : memref<2x10xf32, #tpu.memory_space<vmem>>, vector<2x10xf32>,
    %c0_108 = arith.constant 0 : index
    %c0_109 = arith.constant 0 : index
    %415 = vector.load %arg23[%c0_108, %c0_109] : memref<2x10xf32, #tpu.memory_space<vmem>>, vector<2x10xf32>
    tpu.vector_store %arg23[%c0_108, %c0_109], %403 {strides = array<i32>} : memref<2x10xf32, #tpu.memory_space<vmem>>, vector<2x10xf32>,
    %c0_110 = arith.constant 0 : index
    %c0_111 = arith.constant 0 : index
    %416 = vector.load %arg24[%c0_110, %c0_111] : memref<2x32xf32, #tpu.memory_space<vmem>>, vector<2x32xf32>
    tpu.vector_store %arg24[%c0_110, %c0_111], %398 {strides = array<i32>} : memref<2x32xf32, #tpu.memory_space<vmem>>, vector<2x32xf32>,
    %c0_112 = arith.constant 0 : index
    %c0_113 = arith.constant 0 : index
    %417 = vector.load %arg25[%c0_112, %c0_113] : memref<2x32xf32, #tpu.memory_space<vmem>>, vector<2x32xf32>
    tpu.vector_store %arg25[%c0_112, %c0_113], %384 {strides = array<i32>} : memref<2x32xf32, #tpu.memory_space<vmem>>, vector<2x32xf32>,
    return
  }
  func.func @transform_0(%arg0: i32) -> (i32, i32) {
    %c0_i32 = arith.constant 0 : i32
    %c0_i32_0 = arith.constant 0 : i32
    %c0_i32_1 = arith.constant 0 : i32
    return %c0_i32, %c0_i32_0 : i32, i32
  }
  func.func @transform_1(%arg0: i32) -> (i32, i32) {
    %c0_i32 = arith.constant 0 : i32
    %c0_i32_0 = arith.constant 0 : i32
    %c0_i32_1 = arith.constant 0 : i32
    return %c0_i32, %c0_i32_0 : i32, i32
  }
  func.func @transform_2(%arg0: i32) -> (i32, i32) {
    %c0_i32 = arith.constant 0 : i32
    %c0_i32_0 = arith.constant 0 : i32
    %c0_i32_1 = arith.constant 0 : i32
    return %c0_i32, %c0_i32_0 : i32, i32
  }
  func.func @transform_3(%arg0: i32) -> (i32, i32) {
    %c0_i32 = arith.constant 0 : i32
    %c0_i32_0 = arith.constant 0 : i32
    %c0_i32_1 = arith.constant 0 : i32
    return %c0_i32, %c0_i32_0 : i32, i32
  }
  func.func @transform_4(%arg0: i32) -> (i32, i32) {
    %c0_i32 = arith.constant 0 : i32
    %c0_i32_0 = arith.constant 0 : i32
    %c0_i32_1 = arith.constant 0 : i32
    return %c0_i32, %c0_i32_0 : i32, i32
  }
  func.func @transform_5(%arg0: i32) -> (i32, i32) {
    %c0_i32 = arith.constant 0 : i32
    %c0_i32_0 = arith.constant 0 : i32
    %c0_i32_1 = arith.constant 0 : i32
    return %c0_i32, %c0_i32_0 : i32, i32
  }
  func.func @transform_6(%arg0: i32) -> (i32, i32) {
    %c0_i32 = arith.constant 0 : i32
    %c0_i32_0 = arith.constant 0 : i32
    %c0_i32_1 = arith.constant 0 : i32
    return %c0_i32, %c0_i32_0 : i32, i32
  }
  func.func @transform_7(%arg0: i32) -> (i32, i32) {
    %c0_i32 = arith.constant 0 : i32
    %c0_i32_0 = arith.constant 0 : i32
    %c0_i32_1 = arith.constant 0 : i32
    return %c0_i32, %c0_i32_0 : i32, i32
  }
  func.func @transform_8(%arg0: i32) -> (i32, i32) {
    %c0_i32 = arith.constant 0 : i32
    %c0_i32_0 = arith.constant 0 : i32
    %c0_i32_1 = arith.constant 0 : i32
    return %c0_i32, %c0_i32_0 : i32, i32
  }
  func.func @transform_9(%arg0: i32) -> (i32, i32) {
    %c0_i32 = arith.constant 0 : i32
    %c0_i32_0 = arith.constant 0 : i32
    %c0_i32_1 = arith.constant 0 : i32
    return %c0_i32, %c0_i32_0 : i32, i32
  }
  func.func @transform_10(%arg0: i32) -> (i32, i32) {
    %c0_i32 = arith.constant 0 : i32
    %c0_i32_0 = arith.constant 0 : i32
    %c0_i32_1 = arith.constant 0 : i32
    return %c0_i32, %c0_i32_0 : i32, i32
  }
  func.func @transform_11(%arg0: i32) -> (i32, i32) {
    %c0_i32 = arith.constant 0 : i32
    %c0_i32_0 = arith.constant 0 : i32
    %c0_i32_1 = arith.constant 0 : i32
    return %c0_i32, %c0_i32_0 : i32, i32
  }
  func.func @transform_12(%arg0: i32) -> (i32, i32) {
    %c0_i32 = arith.constant 0 : i32
    %c0_i32_0 = arith.constant 0 : i32
    %c0_i32_1 = arith.constant 0 : i32
    return %c0_i32, %c0_i32_0 : i32, i32
  }
  func.func @transform_13(%arg0: i32) -> (i32, i32) {
    %c0_i32 = arith.constant 0 : i32
    %c0_i32_0 = arith.constant 0 : i32
    %c0_i32_1 = arith.constant 0 : i32
    return %c0_i32, %c0_i32_0 : i32, i32
  }
  func.func @transform_14(%arg0: i32) -> (i32, i32) {
    %c0_i32 = arith.constant 0 : i32
    %c0_i32_0 = arith.constant 0 : i32
    %c0_i32_1 = arith.constant 0 : i32
    return %c0_i32, %c0_i32_0 : i32, i32
  }
  func.func @transform_15(%arg0: i32) -> (i32, i32) {
    %c0_i32 = arith.constant 0 : i32
    %c0_i32_0 = arith.constant 0 : i32
    %c0_i32_1 = arith.constant 0 : i32
    return %c0_i32, %c0_i32_0 : i32, i32
  }
  func.func @transform_16(%arg0: i32) -> (i32, i32) {
    %c0_i32 = arith.constant 0 : i32
    %c0_i32_0 = arith.constant 0 : i32
    %c0_i32_1 = arith.constant 0 : i32
    return %c0_i32, %c0_i32_0 : i32, i32
  }
  func.func @transform_17(%arg0: i32) -> (i32, i32) {
    %c0_i32 = arith.constant 0 : i32
    %c0_i32_0 = arith.constant 0 : i32
    %c0_i32_1 = arith.constant 0 : i32
    return %c0_i32, %c0_i32_0 : i32, i32
  }
  func.func @transform_18(%arg0: i32) -> (i32, i32) {
    %c0_i32 = arith.constant 0 : i32
    %c0_i32_0 = arith.constant 0 : i32
    %c0_i32_1 = arith.constant 0 : i32
    return %c0_i32, %c0_i32_0 : i32, i32
  }
  func.func @transform_19(%arg0: i32) -> (i32, i32) {
    %c0_i32 = arith.constant 0 : i32
    %c0_i32_0 = arith.constant 0 : i32
    %c0_i32_1 = arith.constant 0 : i32
    return %c0_i32, %c0_i32_0 : i32, i32
  }
  func.func @transform_20(%arg0: i32) -> (i32, i32) {
    %c0_i32 = arith.constant 0 : i32
    %c0_i32_0 = arith.constant 0 : i32
    %c0_i32_1 = arith.constant 0 : i32
    return %c0_i32, %c0_i32_0 : i32, i32
  }
  func.func @transform_21(%arg0: i32) -> (i32, i32) {
    %c0_i32 = arith.constant 0 : i32
    %c0_i32_0 = arith.constant 0 : i32
    %c0_i32_1 = arith.constant 0 : i32
    return %c0_i32, %c0_i32_0 : i32, i32
  }
  func.func @transform_22(%arg0: i32) -> (i32, i32) {
    %c0_i32 = arith.constant 0 : i32
    %c0_i32_0 = arith.constant 0 : i32
    %c0_i32_1 = arith.constant 0 : i32
    return %c0_i32, %c0_i32_0 : i32, i32
  }
  func.func @transform_23(%arg0: i32) -> (i32, i32) {
    %c0_i32 = arith.constant 0 : i32
    %c0_i32_0 = arith.constant 0 : i32
    %c0_i32_1 = arith.constant 0 : i32
    return %c0_i32, %c0_i32_0 : i32, i32
  }
  func.func @transform_24(%arg0: i32) -> (i32, i32) {
    %c0_i32 = arith.constant 0 : i32
    %c0_i32_0 = arith.constant 0 : i32
    %c0_i32_1 = arith.constant 0 : i32
    return %c0_i32, %c0_i32_0 : i32, i32
  }
}

</mosaic_0001>

<bundles_post_ra>
// kernel: forward_pallas.1
= control target key start
LH: loop header
LB: loop body
LE: loop exit
PB: predicated region body
PF: predicated region fallthrough
CT: control target
= control target key end

     0   :  { %s3841_s0 = inlined_call_operand.vmem [shape: f32[16,16], index: 0, kind: input, shape index: {}]   ;;  %s3842_s1 = inlined_call_operand.vmem [shape: f32[16,128], index: 1, kind: input, shape index: {}]   ;;  %s3843_s2 = inlined_call_operand.vmem [shape: bf16[32,128], index: 2, kind: input, shape index: {}]   ;;  %s3844_s3 = inlined_call_operand.vmem [shape: f32[1,128], index: 3, kind: input, shape index: {}]   ;;  %s3845_s4 = inlined_call_operand.vmem [shape: bf16[32,128], index: 4, kind: input, shape index: {}]   ;;  %s3846_s5 = inlined_call_operand.vmem [shape: bf16[32,128], index: 5, kind: input, shape index: {}]   ;;  %s3847_s6 = inlined_call_operand.vmem [shape: f32[1,128], index: 6, kind: input, shape index: {}]   ;;  %s3848_s7 = inlined_call_operand.vmem [shape: f32[32,32], index: 7, kind: input, shape index: {}]   ;;  %s3849_s8 = inlined_call_operand.vmem [shape: f32[1,32], index: 8, kind: input, shape index: {}]   ;;  %s3850_s9 = inlined_call_operand.vmem [shape: f32[16,1], index: 9, kind: input, shape index: {}]   ;;  %s3851_s10 = inlined_call_operand.vmem [shape: f32[16,1], index: 10, kind: input, shape index: {}]   ;;  %s3852_s11 = inlined_call_operand.vmem [shape: f32[16,16], index: 11, kind: input, shape index: {}]   ;;  %s3853_s12 = inlined_call_operand.vmem [shape: f32[2,16], index: 12, kind: input, shape index: {}]   ;;  %s3854_s13 = inlined_call_operand.vmem [shape: f32[1,32], index: 13, kind: input, shape index: {}]   ;;  %s3855_s14 = inlined_call_operand.<no memory space> [shape: f32[1,1], index: 14, kind: input, shape index: {}]   ;;  %s3856_s15 = inlined_call_operand.vmem [shape: f32[32,32], index: 15, kind: input, shape index: {}]   ;;  %s3857_s16 = inlined_call_operand.vmem [shape: f32[1,32], index: 16, kind: input, shape index: {}]   ;;  %s3858_s17 = inlined_call_operand.vmem [shape: f32[32,32], index: 17, kind: input, shape index: {}]   ;;  %s3859_s18 = inlined_call_operand.vmem [shape: f32[1,32], index: 18, kind: input, shape index: {}]   ;;  %s3860_s19 = inlined_call_operand.vmem [shape: f32[32,10], index: 19, kind: input, shape index: {}]   ;;  %s3861_s20 = inlined_call_operand.vmem [shape: f32[1,10], index: 20, kind: input, shape index: {}]   ;;  %s3862_s21 = inlined_call_operand.hbm [shape: f32[2,10], index: 21, kind: output, shape index: {0}]   ;;  %s3863_s22 = inlined_call_operand.hbm [shape: f32[2,10], index: 22, kind: output, shape index: {1}]   ;;  %s3864_s23 = inlined_call_operand.hbm [shape: f32[2,32], index: 23, kind: output, shape index: {2}]   ;;  %s3865_s24 = inlined_call_operand.hbm [shape: f32[2,32], index: 24, kind: output, shape index: {3}]  }
   0x1   :  { %3873 = sst [smem:[#allocation14_spill]] %s3841_s0  ;;  %v30_v0 = vstv %s3855_s14 }
   0x2   :  { %3874 = sst [smem:[#allocation15_spill]] %s3842_s1  ;;  %31 = vst [vmem:[#allocation3] sm:$0x1] %v30_v0 }
   0x3   :  { %3875 = sst [smem:[#allocation16_spill]] %s3843_s2 }
   0x4   :  { %3876 = sst [smem:[#allocation17_spill]] %s3844_s3 }
   0x5   :  { %3877 = sst [smem:[#allocation18_spill]] %s3845_s4 }
   0x6   :  { %3878 = sst [smem:[#allocation19_spill]] %s3846_s5 }
   0x7   :  { %3879 = sst [smem:[#allocation20_spill]] %s3847_s6 }
   0x8   :  { %3880 = sst [smem:[#allocation21_spill]] %s3848_s7 }
   0x9   :  { %3881 = sst [smem:[#allocation22_spill]] %s3849_s8 }
   0xa   :  { %32 = vsyncpa [#allocation5], 0 }
   0xb   :  { %33 = vsyncpa [#allocation7], 0  ;;  %s3882_s6 = sld [smem:[#allocation15_spill]]  ;;  %s3883_s30 = sld [smem:[#allocation14_spill]]  ;;  %vm89_vm0 = vcmask 130048  }
  0x11   :  { %v78_v1 = vld [vmem:[%s3882_s6] sm:$0xff]  ;;  %v79_v2 = vld [vmem:[%s3882_s6 + $0x8] sm:$0xff] }
  0x12   :  { %v81_v3 = vld [vmem:[%s3883_s30] sm:$0xff]  ;;  %v2803_v4 = vpack.c.bf16 %v79_v2, %v78_v1  ;;  %v82_v5 = vld [vmem:[%s3883_s30 + $0x8] sm:$0xff] }
  0x13   :  { %2566 = vmatprep.mubr.msk.f32.mxu0 %vm89_vm0, %v81_v3 }
  0x14   :  { %2804 = vmatprep.subr.bf16.mxu0 %v2803_v4 }
  0x15   :  { %2806 = vmatpush3.bf16.msra.mxu0 %v2803_v4 }
  0x16   :  { %34 = vsyncpa [#allocation10], 0  ;;  %s3884_s4 = sld [smem:[#allocation17_spill]]  ;;  %s3140_s1 = smov 64   ;;  %v3141_v20 = vmov 0.0   ;;  %vm3142_vm1 = vmmov 0  }
  0x17   :  { %s3885_s27 = sld [smem:[#allocation18_spill]]  ;;  %s3886_s2 = sld [smem:[#allocation16_spill]]  ;;  %2569 = vmatprep.subr.bf16.mxu1 %v3141_v20  ;;  %2577 = vmatprep.subr.bf16.mxu0 %v3141_v20  ;;  %vm224_vm2 = vcmask 261120   ;;  %vm291_vm3 = vcmask 254976   ;;  %vm1967_vm4 = vcmask 7168   ;;  %vm2331_vm5 = vcmask 74752  }
  0x18   :  { %2567 = vmatmul.mubr.msk.f32.vlgmr.msra.gmra.mrb[0].mxu0 %vm89_vm0, %v82_v5  ;;  %2573 = vmatprep.mubr.msk.bf16.mxu1 %vm3142_vm1, %v3141_v20  ;;  %s3143_s14 = smov 96   ;;  %s3144_s3 = smov 32  }
  0x19   :  { %2581 = vmatprep.mubr.msk.bf16.mxu0 %vm3142_vm1, %v3141_v20  ;;  %s3889_s30 = sld [smem:[#allocation21_spill]]  ;;  %s3890_s6 = sld [smem:[#allocation22_spill]] }
  0x1c   :  { %v2402_v6 = vld [vmem:[%s3884_s4] ss:$0 sm:$0xff]  ;;  %s3887_s4 = sld [smem:[#allocation20_spill]] }
  0x1d   :  { %v3306_v18 = vld [vmem:[%s3885_s27] sm:$0xff]   ;;  %v3320_v21 = vld [vmem:[%s3885_s27 + $0x8] sm:$0xff]   ;;  %s3888_s27 = sld [smem:[#allocation19_spill]] }
  0x1e   :  { %v3311_v19 = vld [vmem:[%s3886_s2] sm:$0xff]   ;;  %2570 = vmatpush3.bf16.msra.mxu1 %v3306_v18  ;;  %v3325_v22 = vld [vmem:[%s3886_s2 + $0x8] sm:$0xff]  }
  0x1f   :  { %2578 = vmatpush3.bf16.msra.mxu0 %v3311_v19  ;;  %2571 = vmatprep.subr.bf16.mxu1 %v3141_v20 }
  0x20   :  { %2579 = vmatprep.subr.bf16.mxu0 %v3141_v20 }
  0x22   :  { %2572 = vmatpush3.bf16.msra.mxu1 %v3320_v21  ;;  %v3357_v29 = vld [vmem:[%s3887_s4] ss:$0 sm:$0xff] }
  0x23   :  { %2580 = vmatpush3.bf16.msra.mxu0 %v3325_v22  ;;  %2585 = vmatprep.subr.bf16.mxu1 %v3141_v20  ;;  %v3378_v4 = vld [vmem:[%s3888_s27] sm:$0xff]  }
  0x24   :  { %2601 = vmatprep.subr.bf16.mxu0 %v3141_v20 }
  0xeb   :  { %v2568_v7 = vpop.f32.mrb[0].mxu0 }
  0xec   :  { %v3296_v8 = vadd.f32 %v2568_v7, %v2402_v6  ;;  %v162_v9 = vpop.f32.mrb[1].mxu0 }
  0xed   :  { %v3298_v10 = vadd.f32 %v2402_v6, %v162_v9  ;;  %v3386_v6 = vld [vmem:[%s3888_s27 + $0x8] sm:$0xff]  }
  0xef   :  { %2899 = vtanh.f32 %v3298_v10  ;;  %v2405_v12 = vmul.f32 -1.442695, %v3298_v10 }
  0xf1   :  { %2901 = vpow2.f32 %v2405_v12 }
  0xf9   :  { %v2900_v11 = vpop.eup %2899 }
  0xfa   :  { %192 = vrot.lane.b32.xlu0 %v2900_v11, %s3140_s1 }
  0xfb   :  { %v2902_v13 = vpop.eup %2901 }
  0xfc   :  { %v187_v14 = vadd.f32 1.0, %v2902_v13 }
  0xfe   :  { %2903 = vrcp.f32 %v187_v14 }
 0x108   :  { %v2904_v15 = vpop.eup %2903 }
 0x16c   :  { %v193_v16 = vpop.permute.xlu0 %192 }
 0x16d   :  { %v195_v17 = vmul.f32 %v2904_v15, %v193_v16 }
 0x16f   :  { %2905 = vtanh.f32 %v195_v17  ;;  %v357_v24 = vrot.slane %v195_v17, 6 }
 0x179   :  { %v2906_v23 = vpop.eup %2905 }
 0x17a   :  { %198 = vrot.lane.b32.xlu0 %v2906_v23, %s3143_s14 }
 0x17e   :  { %358 = vrot.lane.b32.xlu0 %v357_v24, %s3144_s3 }
 0x1ec   :  { %v199_v25 = vpop.permute.xlu0 %198 }
 0x1ed   :  { %v201_v26 = vmul.f32 %v2904_v15, %v199_v25 }
 0x1ef   :  { %v202_v27 = vpack.c.bf16 %v201_v26, %v201_v26 }
 0x1f0   :  { %v359_v49 = vpop.permute.xlu0 %358 }
 0x1f1   :  { %210 = vrot.lane.b32.xlu1 %v202_v27, %s3144_s3 }
 0x263   :  { %v211_v28 = vpop.permute.xlu1 %210 }
 0x264   :  { %2574 = vmatmul.mubr.msk.bf16.vlgmr.msra.gmra.mrb[0].mxu1 %vm224_vm2, %v211_v28  ;;  %2582 = vmatmul.mubr.msk.bf16.vlgmr.msra.gmra.mrb[4].mxu0 %vm224_vm2, %v211_v28 }
 0x265   :  { %2586 = vmatpush3.bf16.msra.mxu1 %v3306_v18  ;;  %2602 = vmatpush3.bf16.msra.mxu0 %v3311_v19 }
 0x266   :  { %2587 = vmatprep.subr.bf16.mxu1 %v3141_v20  ;;  %2603 = vmatprep.subr.bf16.mxu0 %v3141_v20 }
 0x267   :  { %2589 = vmatprep.mubr.msk.bf16.mxu1 %vm3142_vm1, %v3141_v20  ;;  %2605 = vmatprep.mubr.msk.bf16.mxu0 %vm3142_vm1, %v3141_v20 }
 0x269   :  { %2588 = vmatpush3.bf16.msra.mxu1 %v3320_v21  ;;  %2604 = vmatpush3.bf16.msra.mxu0 %v3325_v22 }
 0x26a   :  { %2593 = vmatprep.subr.bf16.mxu1 %v3141_v20  ;;  %2609 = vmatprep.subr.bf16.mxu0 %v3141_v20 }
 0x337   :  { %v262_v30 = vpop.f32.mrb[0].mxu1  ;;  %v339_v31 = vpop.f32.mrb[4].mxu0 }
 0x338   :  { %v263_v32 = vadd.f32 %v3357_v29, %v262_v30  ;;  %v346_v33 = vrot.slane %v339_v31, 6  ;;  %v2575_v34 = vpop.f32.mrb[1].mxu1  ;;  %v2583_v35 = vpop.f32.mrb[5].mxu0 }
 0x339   :  { %v265_v36 = vpop.f32.mrb[2].mxu1  ;;  %v342_v37 = vpop.f32.mrb[6].mxu0 }
 0x33a   :  { %2907 = vtanh.f32 %v263_v32  ;;  %v348_v38 = vadd.f32 %v346_v33, %v3298_v10  ;;  %v2576_v39 = vpop.f32.mrb[3].mxu1  ;;  %v2584_v40 = vpop.f32.mrb[7].mxu0  ;;  %v2410_v43 = vmul.f32 -1.442695, %v263_v32 }
 0x33c   :  { %2909 = vtanh.f32 %v348_v38  ;;  %v2414_v44 = vmul.f32 -1.442695, %v348_v38 }
 0x33d   :  { %2911 = vpow2.f32 %v2410_v43 }
 0x33e   :  { %2913 = vpow2.f32 %v2414_v44 }
 0x344   :  { %v2908_v41 = vpop.eup %2907 }
 0x345   :  { %276 = vrot.lane.b32.xlu0 %v2908_v41, %s3140_s1 }
 0x346   :  { %v2910_v42 = vpop.eup %2909 }
 0x347   :  { %363 = vrot.lane.b32.xlu1 %v2910_v42, %s3140_s1  ;;  %v2912_v45 = vpop.eup %2911 }
 0x348   :  { %v2914_v46 = vpop.eup %2913  ;;  %v271_v47 = vadd.f32 1.0, %v2912_v45 }
 0x349   :  { %v352_v48 = vadd.f32 1.0, %v2914_v46 }
 0x34a   :  { %2915 = vrcp.f32 %v271_v47 }
 0x34b   :  { %2917 = vrcp.f32 %v352_v48 }
 0x354   :  { %v2916_v50 = vpop.eup %2915 }
 0x355   :  { %v2918_v53 = vpop.eup %2917 }
 0x356   :  { %v361_v57 = vmul.f32 %v2918_v53, %v359_v49 }
 0x3b7   :  { %v277_v51 = vpop.permute.xlu0 %276 }
 0x3b8   :  { %v279_v52 = vmul.f32 %v2916_v50, %v277_v51 }
 0x3b9   :  { %v364_v54 = vpop.permute.xlu1 %363 }
 0x3ba   :  { %2919 = vtanh.f32 %v279_v52  ;;  %v366_v55 = vmul.f32 %v2918_v53, %v364_v54 }
 0x3bc   :  { %368 = vrot.lane.b32.xlu1 %v366_v55, %s3144_s3 }
 0x3c4   :  { %v2920_v56 = vpop.eup %2919 }
 0x3c5   :  { %282 = vrot.lane.b32.xlu0 %v2920_v56, %s3143_s14 }
 0x42e   :  { %v369_v58 = vpop.permute.xlu1 %368 }
 0x42f   :  { %v3365_v59 = vadd.f32 %v369_v58, %v361_v57 }
 0x431   :  { %2921 = vtanh.f32 %v3365_v59  ;;  %v571_v41 = vrot.slane %v3365_v59, 6 }
 0x437   :  { %v283_v60 = vpop.permute.xlu0 %282 }
 0x438   :  { %v3368_v61 = vmul.f32 %v2916_v50, %v283_v60 }
 0x43a   :  { %v286_v62 = vpack.c.bf16 %v3368_v61, %v3368_v61 }
 0x43b   :  { %v2922_v63 = vpop.eup %2921 }
 0x43c   :  { %427 = vrot.lane.b32.xlu0 %v286_v62, %s3144_s3  ;;  %374 = vrot.lane.b32.xlu1 %v2922_v63, %s3140_s1 }
 0x4ae   :  { %v375_v0 = vpop.permute.xlu1 %374  ;;  %v428_v7 = vpop.permute.xlu0 %427 }
 0x4af   :  { %v377_v1 = vmul.f32 %v2918_v53, %v375_v0 }
 0x4b1   :  { %v378_v2 = vpack.c.bf16 %v377_v1, %v377_v1 }
 0x4b3   :  { %v380_v3 = vrot.slane %v378_v2, 1 }
 0x4b5   :  { %381 = vrot.lane.b32.xlu1 %v380_v3, %s3144_s3 }
 0x527   :  { %v382_v5 = vpop.permute.xlu1 %381 }
 0x528   :  { %2590 = vmatmul.mubr.msk.bf16.vlgmr.msra.gmra.mrb[4].mxu1 %vm224_vm2, %v382_v5  ;;  %2606 = vmatmul.mubr.msk.bf16.vlgmr.msra.gmra.mrb[8].mxu0 %vm224_vm2, %v382_v5 }
 0x529   :  { %2594 = vmatpush3.bf16.msra.mxu1 %v3378_v4  ;;  %2597 = vmatprep.mubr.msk.bf16.mxu1 %vm3142_vm1, %v3141_v20 }
 0x52a   :  { %2595 = vmatprep.subr.bf16.mxu1 %v3141_v20  ;;  %2610 = vmatpush3.bf16.msra.mxu0 %v3306_v18 }
 0x52b   :  { %2611 = vmatprep.subr.bf16.mxu0 %v3141_v20  ;;  %2613 = vmatprep.mubr.msk.bf16.mxu0 %vm3142_vm1, %v3141_v20 }
 0x52d   :  { %2596 = vmatpush3.bf16.msra.mxu1 %v3386_v6 }
 0x52e   :  { %2625 = vmatprep.subr.bf16.mxu1 %v3141_v20  ;;  %2612 = vmatpush3.bf16.msra.mxu0 %v3320_v21 }
 0x52f   :  { %2617 = vmatprep.subr.bf16.mxu0 %v3141_v20 }
 0x534   :  { %2598 = vmatmul.mubr.msk.bf16.vlgmr.msra.gmra.mrb[4].mxu1 %vm224_vm2, %v428_v7 }
 0x535   :  { %2626 = vmatpush3.bf16.msra.mxu1 %v3311_v19  ;;  %2629 = vmatprep.mubr.msk.bf16.mxu1 %vm3142_vm1, %v3141_v20 }
 0x536   :  { %2627 = vmatprep.subr.bf16.mxu1 %v3141_v20 }
 0x539   :  { %2628 = vmatpush3.bf16.msra.mxu1 %v3325_v22 }
 0x53a   :  { %2633 = vmatprep.subr.bf16.mxu1 %v3141_v20 }
 0x5fb   :  { %v553_v9 = vpop.f32.mrb[8].mxu0 }
 0x5fc   :  { %v560_v11 = vrot.slane %v553_v9, 4  ;;  %v2607_v12 = vpop.f32.mrb[9].mxu0 }
 0x5fd   :  { %v556_v13 = vpop.f32.mrb[10].mxu0 }
 0x5fe   :  { %v562_v14 = vadd.f32 %v560_v11, %v3298_v10  ;;  %v2608_v15 = vpop.f32.mrb[11].mxu0 }
 0x600   :  { %2923 = vtanh.f32 %v562_v14  ;;  %v2421_v28 = vmul.f32 -1.442695, %v562_v14 }
 0x607   :  { %v478_v16 = vpop.f32.mrb[4].mxu1 }
 0x608   :  { %v2840_v17 = vadd.f32 %v3357_v29, %v478_v16  ;;  %v2599_v23 = vpop.f32.mrb[5].mxu1 }
 0x609   :  { %v481_v24 = vpop.f32.mrb[6].mxu1 }
 0x60a   :  { %v2924_v25 = vpop.eup %2923  ;;  %2925 = vtanh.f32 %v2840_v17  ;;  %v2600_v26 = vpop.f32.mrb[7].mxu1  ;;  %v2419_v30 = vmul.f32 -1.442695, %v2840_v17 }
 0x60b   :  { %575 = vrot.lane.b32.xlu1 %v2924_v25, %s3140_s1  ;;  %2927 = vpow2.f32 %v2421_v28 }
 0x60c   :  { %2929 = vpow2.f32 %v2419_v30 }
 0x614   :  { %v2926_v27 = vpop.eup %2925 }
 0x615   :  { %498 = vrot.lane.b32.xlu0 %v2926_v27, %s3140_s1  ;;  %v2928_v31 = vpop.eup %2927 }
 0x616   :  { %v566_v32 = vadd.f32 1.0, %v2928_v31  ;;  %v2930_v33 = vpop.eup %2929 }
 0x617   :  { %v488_v34 = vadd.f32 1.0, %v2930_v33 }
 0x618   :  { %2931 = vrcp.f32 %v566_v32 }
 0x619   :  { %493 = vrot.lane.b32.xlu0 %v279_v52, %s3144_s3  ;;  %2933 = vrcp.f32 %v488_v34 }
 0x622   :  { %v2932_v35 = vpop.eup %2931 }
 0x623   :  { %v2934_v38 = vpop.eup %2933  ;;  %v573_v42 = vmul.f32 %v2932_v35, %v571_v41 }
 0x67d   :  { %v576_v36 = vpop.permute.xlu1 %575 }
 0x67e   :  { %v578_v37 = vmul.f32 %v2932_v35, %v576_v36 }
 0x680   :  { %580 = vrot.lane.b32.xlu1 %v578_v37, %s3144_s3 }
 0x687   :  { %v499_v39 = vpop.permute.xlu0 %498 }
 0x688   :  { %v501_v40 = vmul.f32 %v2934_v38, %v499_v39 }
 0x68a   :  { %503 = vrot.lane.b32.xlu1 %v501_v40, %s3144_s3 }
 0x68b   :  { %v494_v45 = vpop.permute.xlu0 %493 }
 0x68c   :  { %v496_v46 = vmul.f32 %v2934_v38, %v494_v45 }
 0x6f2   :  { %v581_v43 = vpop.permute.xlu1 %580 }
 0x6f3   :  { %v3414_v44 = vadd.f32 %v581_v43, %v573_v42 }
 0x6f5   :  { %2935 = vtanh.f32 %v3414_v44  ;;  %v767_v31 = vrot.slane %v3414_v44, 6 }
 0x6fc   :  { %v504_v47 = vpop.permute.xlu1 %503 }
 0x6fd   :  { %v3417_v48 = vadd.f32 %v504_v47, %v496_v46 }
 0x6ff   :  { %v2936_v49 = vpop.eup %2935  ;;  %2937 = vtanh.f32 %v3417_v48 }
 0x700   :  { %586 = vrot.lane.b32.xlu0 %v2936_v49, %s3140_s1 }
 0x709   :  { %v2938_v50 = vpop.eup %2937 }
 0x70a   :  { %509 = vrot.lane.b32.xlu1 %v2938_v50, %s3140_s1 }
 0x772   :  { %v587_v51 = vpop.permute.xlu0 %586 }
 0x773   :  { %v589_v52 = vmul.f32 %v2932_v35, %v587_v51 }
 0x775   :  { %v590_v53 = vpack.c.bf16 %v589_v52, %v589_v52 }
 0x777   :  { %v592_v54 = vrot.slane %v590_v53, 2 }
 0x779   :  { %593 = vrot.lane.b32.xlu0 %v592_v54, %s3144_s3 }
 0x77c   :  { %v510_v55 = vpop.permute.xlu1 %509 }
 0x77d   :  { %v3423_v56 = vmul.f32 %v2934_v38, %v510_v55 }
 0x77f   :  { %v513_v57 = vpack.c.bf16 %v3423_v56, %v3423_v56 }
 0x781   :  { %639 = vrot.lane.b32.xlu1 %v513_v57, %s3144_s3 }
 0x7eb   :  { %v594_v58 = vpop.permute.xlu0 %593 }
 0x7ec   :  { %2614 = vmatmul.mubr.msk.bf16.vlgmr.msra.gmra.mrb[12].mxu0 %vm224_vm2, %v594_v58  ;;  %2630 = vmatmul.mubr.msk.bf16.vlgmr.msra.gmra.mrb[8].mxu1 %vm224_vm2, %v594_v58 }
 0x7ed   :  { %2618 = vmatpush3.bf16.msra.mxu0 %v3378_v4  ;;  %2621 = vmatprep.mubr.msk.bf16.mxu0 %vm3142_vm1, %v3141_v20 }
 0x7ee   :  { %2619 = vmatprep.subr.bf16.mxu0 %v3141_v20  ;;  %2634 = vmatpush3.bf16.msra.mxu1 %v3306_v18 }
 0x7ef   :  { %2635 = vmatprep.subr.bf16.mxu1 %v3141_v20  ;;  %2637 = vmatprep.mubr.msk.bf16.mxu1 %vm3142_vm1, %v3141_v20 }
 0x7f1   :  { %2620 = vmatpush3.bf16.msra.mxu0 %v3386_v6 }
 0x7f2   :  { %2649 = vmatprep.subr.bf16.mxu0 %v3141_v20  ;;  %2636 = vmatpush3.bf16.msra.mxu1 %v3320_v21 }
 0x7f3   :  { %2641 = vmatprep.subr.bf16.mxu1 %v3141_v20  ;;  %v640_v59 = vpop.permute.xlu1 %639 }
 0x7f8   :  { %2622 = vmatmul.mubr.msk.bf16.vlgmr.msra.gmra.mrb[12].mxu0 %vm224_vm2, %v640_v59 }
 0x7f9   :  { %2650 = vmatpush3.bf16.msra.mxu0 %v3311_v19  ;;  %2653 = vmatprep.mubr.msk.bf16.mxu0 %vm3142_vm1, %v3141_v20 }
 0x7fa   :  { %2651 = vmatprep.subr.bf16.mxu0 %v3141_v20 }
 0x7fd   :  { %2652 = vmatpush3.bf16.msra.mxu0 %v3325_v22 }
 0x7fe   :  { %2657 = vmatprep.subr.bf16.mxu0 %v3141_v20 }
 0x8bf   :  { %v749_v60 = vpop.f32.mrb[8].mxu1 }
 0x8c0   :  { %v756_v62 = vrot.slane %v749_v60, 2  ;;  %v2631_v63 = vpop.f32.mrb[9].mxu1 }
 0x8c1   :  { %v752_v0 = vpop.f32.mrb[10].mxu1 }
 0x8c2   :  { %v758_v1 = vadd.f32 %v756_v62, %v3298_v10  ;;  %v2632_v2 = vpop.f32.mrb[11].mxu1 }
 0x8c4   :  { %2939 = vtanh.f32 %v758_v1  ;;  %v2426_v14 = vmul.f32 -1.442695, %v758_v1 }
 0x8cb   :  { %v678_v3 = vpop.f32.mrb[12].mxu0 }
 0x8cc   :  { %v2841_v5 = vadd.f32 %v3357_v29, %v678_v3  ;;  %v2623_v7 = vpop.f32.mrb[13].mxu0 }
 0x8cd   :  { %v681_v9 = vpop.f32.mrb[14].mxu0 }
 0x8ce   :  { %v2940_v11 = vpop.eup %2939  ;;  %2941 = vtanh.f32 %v2841_v5  ;;  %v2624_v12 = vpop.f32.mrb[15].mxu0  ;;  %v2424_v15 = vmul.f32 -1.442695, %v2841_v5 }
 0x8cf   :  { %771 = vrot.lane.b32.xlu0 %v2940_v11, %s3140_s1  ;;  %2943 = vpow2.f32 %v2426_v14 }
 0x8d0   :  { %2945 = vpow2.f32 %v2424_v15 }
 0x8d8   :  { %v2942_v13 = vpop.eup %2941 }
 0x8d9   :  { %694 = vrot.lane.b32.xlu1 %v2942_v13, %s3140_s1  ;;  %v2944_v16 = vpop.eup %2943 }
 0x8da   :  { %v762_v10 = vadd.f32 1.0, %v2944_v16  ;;  %v2946_v17 = vpop.eup %2945 }
 0x8db   :  { %v688_v23 = vadd.f32 1.0, %v2946_v17 }
 0x8dc   :  { %2947 = vrcp.f32 %v762_v10 }
 0x8dd   :  { %2949 = vrcp.f32 %v688_v23 }
 0x8e6   :  { %v2948_v24 = vpop.eup %2947 }
 0x8e7   :  { %v2950_v27 = vpop.eup %2949  ;;  %v769_v32 = vmul.f32 %v2948_v24, %v767_v31 }
 0x8e8   :  { %v692_v35 = vmul.f32 %v2950_v27, %v3417_v48 }
 0x941   :  { %v772_v25 = vpop.permute.xlu0 %771 }
 0x942   :  { %v774_v26 = vmul.f32 %v2948_v24, %v772_v25 }
 0x944   :  { %776 = vrot.lane.b32.xlu0 %v774_v26, %s3144_s3 }
 0x94b   :  { %v695_v28 = vpop.permute.xlu1 %694 }
 0x94c   :  { %v697_v30 = vmul.f32 %v2950_v27, %v695_v28 }
 0x94e   :  { %699 = vrot.lane.b32.xlu1 %v697_v30, %s3144_s3 }
 0x9b6   :  { %v777_v33 = vpop.permute.xlu0 %776 }
 0x9b7   :  { %v3456_v34 = vadd.f32 %v777_v33, %v769_v32 }
 0x9b9   :  { %2951 = vtanh.f32 %v3456_v34  ;;  %v960_v15 = vrot.slane %v3456_v34, 6 }
 0x9c0   :  { %v700_v36 = vpop.permute.xlu1 %699 }
 0x9c1   :  { %v3460_v37 = vadd.f32 %v700_v36, %v692_v35 }
 0x9c3   :  { %v2952_v38 = vpop.eup %2951  ;;  %2953 = vtanh.f32 %v3460_v37 }
 0x9c4   :  { %782 = vrot.lane.b32.xlu0 %v2952_v38, %s3140_s1 }
 0x9cd   :  { %v2954_v39 = vpop.eup %2953 }
 0x9ce   :  { %705 = vrot.lane.b32.xlu1 %v2954_v39, %s3140_s1 }
 0xa36   :  { %v783_v40 = vpop.permute.xlu0 %782 }
 0xa37   :  { %v785_v41 = vmul.f32 %v2948_v24, %v783_v40 }
 0xa39   :  { %v786_v42 = vpack.c.bf16 %v785_v41, %v785_v41 }
 0xa3b   :  { %v788_v43 = vrot.slane %v786_v42, 3 }
 0xa3d   :  { %789 = vrot.lane.b32.xlu0 %v788_v43, %s3144_s3 }
 0xa40   :  { %v706_v44 = vpop.permute.xlu1 %705 }
 0xa41   :  { %v3466_v45 = vmul.f32 %v2950_v27, %v706_v44 }
 0xa43   :  { %v709_v46 = vpack.c.bf16 %v3466_v45, %v3466_v45 }
 0xa45   :  { %835 = vrot.lane.b32.xlu1 %v709_v46, %s3144_s3 }
 0xaaf   :  { %v790_v47 = vpop.permute.xlu0 %789 }
 0xab0   :  { %2638 = vmatmul.mubr.msk.bf16.vlgmr.msra.gmra.mrb[12].mxu1 %vm224_vm2, %v790_v47  ;;  %2654 = vmatmul.mubr.msk.bf16.vlgmr.msra.gmra.mrb[16].mxu0 %vm224_vm2, %v790_v47 }
 0xab1   :  { %2642 = vmatpush3.bf16.msra.mxu1 %v3378_v4  ;;  %2645 = vmatprep.mubr.msk.bf16.mxu1 %vm3142_vm1, %v3141_v20 }
 0xab2   :  { %2643 = vmatprep.subr.bf16.mxu1 %v3141_v20  ;;  %2658 = vmatpush3.bf16.msra.mxu0 %v3306_v18 }
 0xab3   :  { %2659 = vmatprep.subr.bf16.mxu0 %v3141_v20  ;;  %2661 = vmatprep.mubr.msk.bf16.mxu0 %vm3142_vm1, %v3141_v20 }
 0xab5   :  { %2644 = vmatpush3.bf16.msra.mxu1 %v3386_v6 }
 0xab6   :  { %2673 = vmatprep.subr.bf16.mxu1 %v3141_v20  ;;  %2660 = vmatpush3.bf16.msra.mxu0 %v3320_v21 }
 0xab7   :  { %2665 = vmatprep.subr.bf16.mxu0 %v3141_v20  ;;  %v836_v48 = vpop.permute.xlu1 %835 }
 0xabc   :  { %2646 = vmatmul.mubr.msk.bf16.vlgmr.msra.gmra.mrb[12].mxu1 %vm224_vm2, %v836_v48 }
 0xabd   :  { %2674 = vmatpush3.bf16.msra.mxu1 %v3311_v19  ;;  %2677 = vmatprep.mubr.msk.bf16.mxu1 %vm3142_vm1, %v3141_v20 }
 0xabe   :  { %2675 = vmatprep.subr.bf16.mxu1 %v3141_v20 }
 0xac1   :  { %2676 = vmatpush3.bf16.msra.mxu1 %v3325_v22 }
 0xac2   :  { %2681 = vmatprep.subr.bf16.mxu1 %v3141_v20 }
 0xb83   :  { %v945_v49 = vpop.f32.mrb[16].mxu0 }
 0xb84   :  { %v951_v50 = vadd.f32 %v945_v49, %v3296_v8  ;;  %v2655_v51 = vpop.f32.mrb[17].mxu0 }
 0xb85   :  { %v948_v52 = vpop.f32.mrb[18].mxu0 }
 0xb86   :  { %2955 = vtanh.f32 %v951_v50  ;;  %v2656_v53 = vpop.f32.mrb[19].mxu0  ;;  %v2431_v63 = vmul.f32 -1.442695, %v951_v50 }
 0xb8f   :  { %v874_v54 = vpop.f32.mrb[12].mxu1 }
 0xb90   :  { %v2956_v55 = vpop.eup %2955  ;;  %v2842_v57 = vadd.f32 %v3357_v29, %v874_v54  ;;  %v2647_v58 = vpop.f32.mrb[13].mxu1 }
 0xb91   :  { %964 = vrot.lane.b32.xlu0 %v2956_v55, %s3140_s1  ;;  %v877_v59 = vpop.f32.mrb[14].mxu1 }
 0xb92   :  { %2957 = vtanh.f32 %v2842_v57  ;;  %v2648_v60 = vpop.f32.mrb[15].mxu1  ;;  %v2429_v0 = vmul.f32 -1.442695, %v2842_v57 }
 0xb93   :  { %2959 = vpow2.f32 %v2431_v63 }
 0xb94   :  { %2961 = vpow2.f32 %v2429_v0 }
 0xb9c   :  { %v2958_v62 = vpop.eup %2957 }
 0xb9d   :  { %890 = vrot.lane.b32.xlu1 %v2958_v62, %s3140_s1  ;;  %v2960_v1 = vpop.eup %2959 }
 0xb9e   :  { %v955_v2 = vadd.f32 1.0, %v2960_v1  ;;  %v2962_v3 = vpop.eup %2961 }
 0xb9f   :  { %v884_v5 = vadd.f32 1.0, %v2962_v3 }
 0xba0   :  { %2963 = vrcp.f32 %v955_v2 }
 0xba1   :  { %2965 = vrcp.f32 %v884_v5 }
 0xbaa   :  { %v2964_v7 = vpop.eup %2963 }
 0xbab   :  { %v2966_v12 = vpop.eup %2965  ;;  %v962_v16 = vmul.f32 %v2964_v7, %v960_v15 }
 0xbac   :  { %v888_v23 = vmul.f32 %v2966_v12, %v3460_v37 }
 0xc03   :  { %v965_v9 = vpop.permute.xlu0 %964 }
 0xc04   :  { %v967_v11 = vmul.f32 %v2964_v7, %v965_v9 }
 0xc06   :  { %969 = vrot.lane.b32.xlu0 %v967_v11, %s3144_s3 }
 0xc0f   :  { %v891_v13 = vpop.permute.xlu1 %890 }
 0xc10   :  { %v893_v14 = vmul.f32 %v2966_v12, %v891_v13 }
 0xc12   :  { %895 = vrot.lane.b32.xlu1 %v893_v14, %s3144_s3 }
 0xc78   :  { %v970_v10 = vpop.permute.xlu0 %969 }
 0xc79   :  { %v3499_v17 = vadd.f32 %v970_v10, %v962_v16 }
 0xc7b   :  { %2967 = vtanh.f32 %v3499_v17  ;;  %v1155_v1 = vrot.slane %v3499_v17, 6 }
 0xc84   :  { %v896_v24 = vpop.permute.xlu1 %895 }
 0xc85   :  { %v2968_v25 = vpop.eup %2967  ;;  %v3503_v26 = vadd.f32 %v896_v24, %v888_v23 }
 0xc86   :  { %975 = vrot.lane.b32.xlu0 %v2968_v25, %s3140_s1 }
 0xc87   :  { %2969 = vtanh.f32 %v3503_v26 }
 0xc91   :  { %v2970_v27 = vpop.eup %2969 }
 0xc92   :  { %901 = vrot.lane.b32.xlu1 %v2970_v27, %s3140_s1 }
 0xcf8   :  { %v976_v28 = vpop.permute.xlu0 %975 }
 0xcf9   :  { %v978_v30 = vmul.f32 %v2964_v7, %v976_v28 }
 0xcfb   :  { %v979_v31 = vpack.c.bf16 %v978_v30, %v978_v30 }
 0xcfd   :  { %981 = vrot.lane.b32.xlu0 %v979_v31, %s3144_s3 }
 0xd04   :  { %v902_v32 = vpop.permute.xlu1 %901 }
 0xd05   :  { %v3509_v33 = vmul.f32 %v2966_v12, %v902_v32 }
 0xd07   :  { %v905_v34 = vpack.c.bf16 %v3509_v33, %v3509_v33 }
 0xd09   :  { %1027 = vrot.lane.b32.xlu1 %v905_v34, %s3144_s3 }
 0xd6f   :  { %v982_v35 = vpop.permute.xlu0 %981 }
 0xd70   :  { %2662 = vmatmul.mubr.msk.bf16.vlgmr.msra.gmra.mrb[20].mxu0 %vm224_vm2, %v982_v35  ;;  %2678 = vmatmul.mubr.msk.bf16.vlgmr.msra.gmra.mrb[16].mxu1 %vm224_vm2, %v982_v35 }
 0xd71   :  { %2666 = vmatpush3.bf16.msra.mxu0 %v3378_v4  ;;  %2669 = vmatprep.mubr.msk.bf16.mxu0 %vm3142_vm1, %v3141_v20 }
 0xd72   :  { %2667 = vmatprep.subr.bf16.mxu0 %v3141_v20  ;;  %2682 = vmatpush3.bf16.msra.mxu1 %v3306_v18 }
 0xd73   :  { %2683 = vmatprep.subr.bf16.mxu1 %v3141_v20  ;;  %2685 = vmatprep.mubr.msk.bf16.mxu1 %vm3142_vm1, %v3141_v20 }
 0xd75   :  { %2668 = vmatpush3.bf16.msra.mxu0 %v3386_v6 }
 0xd76   :  { %2697 = vmatprep.subr.bf16.mxu0 %v3141_v20  ;;  %2684 = vmatpush3.bf16.msra.mxu1 %v3320_v21 }
 0xd77   :  { %2689 = vmatprep.subr.bf16.mxu1 %v3141_v20 }
 0xd7b   :  { %v1028_v36 = vpop.permute.xlu1 %1027 }
 0xd7c   :  { %2670 = vmatmul.mubr.msk.bf16.vlgmr.msra.gmra.mrb[20].mxu0 %vm224_vm2, %v1028_v36 }
 0xd7d   :  { %2698 = vmatpush3.bf16.msra.mxu0 %v3311_v19  ;;  %2701 = vmatprep.mubr.msk.bf16.mxu0 %vm3142_vm1, %v3141_v20 }
 0xd7e   :  { %2699 = vmatprep.subr.bf16.mxu0 %v3141_v20 }
 0xd81   :  { %2700 = vmatpush3.bf16.msra.mxu0 %v3325_v22 }
 0xd82   :  { %2705 = vmatprep.subr.bf16.mxu0 %v3141_v20 }
 0xe43   :  { %v1137_v37 = vpop.f32.mrb[16].mxu1 }
 0xe44   :  { %v1144_v38 = vrot.slane %v1137_v37, 6  ;;  %v2679_v39 = vpop.f32.mrb[17].mxu1 }
 0xe45   :  { %v1140_v40 = vpop.f32.mrb[18].mxu1 }
 0xe46   :  { %v1146_v41 = vadd.f32 %v1144_v38, %v3296_v8  ;;  %v2680_v42 = vpop.f32.mrb[19].mxu1 }
 0xe48   :  { %2971 = vtanh.f32 %v1146_v41  ;;  %v2436_v51 = vmul.f32 -1.442695, %v1146_v41 }
 0xe4f   :  { %v1066_v43 = vpop.f32.mrb[20].mxu0 }
 0xe50   :  { %v2843_v44 = vadd.f32 %v3357_v29, %v1066_v43  ;;  %v2671_v46 = vpop.f32.mrb[21].mxu0 }
 0xe51   :  { %v1069_v47 = vpop.f32.mrb[22].mxu0 }
 0xe52   :  { %v2972_v48 = vpop.eup %2971  ;;  %2973 = vtanh.f32 %v2843_v44  ;;  %v2672_v49 = vpop.f32.mrb[23].mxu0  ;;  %v2434_v52 = vmul.f32 -1.442695, %v2843_v44 }
 0xe53   :  { %1159 = vrot.lane.b32.xlu0 %v2972_v48, %s3140_s1  ;;  %2975 = vpow2.f32 %v2436_v51 }
 0xe54   :  { %2977 = vpow2.f32 %v2434_v52 }
 0xe5c   :  { %v2974_v50 = vpop.eup %2973 }
 0xe5d   :  { %1082 = vrot.lane.b32.xlu1 %v2974_v50, %s3140_s1  ;;  %v2976_v53 = vpop.eup %2975 }
 0xe5e   :  { %v1150_v54 = vadd.f32 1.0, %v2976_v53  ;;  %v2978_v55 = vpop.eup %2977 }
 0xe5f   :  { %v1076_v57 = vadd.f32 1.0, %v2978_v55 }
 0xe60   :  { %2979 = vrcp.f32 %v1150_v54 }
 0xe61   :  { %2981 = vrcp.f32 %v1076_v57 }
 0xe6a   :  { %v2980_v58 = vpop.eup %2979 }
 0xe6b   :  { %v2982_v62 = vpop.eup %2981  ;;  %v1157_v2 = vmul.f32 %v2980_v58, %v1155_v1 }
 0xe6c   :  { %v1080_v7 = vmul.f32 %v2982_v62, %v3503_v26 }
 0xec5   :  { %v1160_v59 = vpop.permute.xlu0 %1159 }
 0xec6   :  { %v1162_v60 = vmul.f32 %v2980_v58, %v1160_v59 }
 0xec8   :  { %1164 = vrot.lane.b32.xlu0 %v1162_v60, %s3144_s3 }
 0xecf   :  { %v1083_v63 = vpop.permute.xlu1 %1082 }
 0xed0   :  { %v1085_v0 = vmul.f32 %v2982_v62, %v1083_v63 }
 0xed2   :  { %1087 = vrot.lane.b32.xlu1 %v1085_v0, %s3144_s3 }
 0xf3a   :  { %v1165_v3 = vpop.permute.xlu0 %1164 }
 0xf3b   :  { %v3542_v5 = vadd.f32 %v1165_v3, %v1157_v2 }
 0xf3d   :  { %2983 = vtanh.f32 %v3542_v5  ;;  %v1351_v53 = vrot.slane %v3542_v5, 6 }
 0xf44   :  { %v1088_v9 = vpop.permute.xlu1 %1087 }
 0xf45   :  { %v3546_v11 = vadd.f32 %v1088_v9, %v1080_v7 }
 0xf47   :  { %v2984_v12 = vpop.eup %2983  ;;  %2985 = vtanh.f32 %v3546_v11 }
 0xf48   :  { %1170 = vrot.lane.b32.xlu0 %v2984_v12, %s3140_s1 }
 0xf51   :  { %v2986_v13 = vpop.eup %2985 }
 0xf52   :  { %1093 = vrot.lane.b32.xlu1 %v2986_v13, %s3140_s1 }
 0xfba   :  { %v1171_v14 = vpop.permute.xlu0 %1170 }
 0xfbb   :  { %v1173_v15 = vmul.f32 %v2980_v58, %v1171_v14 }
 0xfbd   :  { %v1174_v16 = vpack.c.bf16 %v1173_v15, %v1173_v15 }
 0xfbf   :  { %v1176_v10 = vrot.slane %v1174_v16, 1 }
 0xfc1   :  { %1177 = vrot.lane.b32.xlu0 %v1176_v10, %s3144_s3 }
 0xfc4   :  { %v1094_v17 = vpop.permute.xlu1 %1093 }
 0xfc5   :  { %v3552_v23 = vmul.f32 %v2982_v62, %v1094_v17 }
 0xfc7   :  { %v1097_v24 = vpack.c.bf16 %v3552_v23, %v3552_v23 }
 0xfc9   :  { %1223 = vrot.lane.b32.xlu1 %v1097_v24, %s3144_s3 }
0x1033   :  { %v1178_v25 = vpop.permute.xlu0 %1177 }
0x1034   :  { %2686 = vmatmul.mubr.msk.bf16.vlgmr.msra.gmra.mrb[20].mxu1 %vm224_vm2, %v1178_v25  ;;  %2702 = vmatmul.mubr.msk.bf16.vlgmr.msra.gmra.mrb[24].mxu0 %vm224_vm2, %v1178_v25 }
0x1035   :  { %2690 = vmatpush3.bf16.msra.mxu1 %v3378_v4  ;;  %2693 = vmatprep.mubr.msk.bf16.mxu1 %vm3142_vm1, %v3141_v20 }
0x1036   :  { %2691 = vmatprep.subr.bf16.mxu1 %v3141_v20  ;;  %2706 = vmatpush3.bf16.msra.mxu0 %v3306_v18 }
0x1037   :  { %2707 = vmatprep.subr.bf16.mxu0 %v3141_v20  ;;  %2709 = vmatprep.mubr.msk.bf16.mxu0 %vm3142_vm1, %v3141_v20 }
0x1039   :  { %2692 = vmatpush3.bf16.msra.mxu1 %v3386_v6 }
0x103a   :  { %2721 = vmatprep.subr.bf16.mxu1 %v3141_v20  ;;  %2708 = vmatpush3.bf16.msra.mxu0 %v3320_v21 }
0x103b   :  { %2713 = vmatprep.subr.bf16.mxu0 %v3141_v20  ;;  %v1224_v26 = vpop.permute.xlu1 %1223 }
0x1040   :  { %2694 = vmatmul.mubr.msk.bf16.vlgmr.msra.gmra.mrb[20].mxu1 %vm224_vm2, %v1224_v26 }
0x1041   :  { %2722 = vmatpush3.bf16.msra.mxu1 %v3311_v19  ;;  %2725 = vmatprep.mubr.msk.bf16.mxu1 %vm3142_vm1, %v3141_v20 }
0x1042   :  { %2723 = vmatprep.subr.bf16.mxu1 %v3141_v20 }
0x1045   :  { %2724 = vmatpush3.bf16.msra.mxu1 %v3325_v22 }
0x1046   :  { %2729 = vmatprep.subr.bf16.mxu1 %v3141_v20 }
0x1107   :  { %v1333_v27 = vpop.f32.mrb[24].mxu0 }
0x1108   :  { %v1340_v28 = vrot.slane %v1333_v27, 4  ;;  %v2703_v30 = vpop.f32.mrb[25].mxu0 }
0x1109   :  { %v1336_v31 = vpop.f32.mrb[26].mxu0 }
0x110a   :  { %v1342_v32 = vadd.f32 %v1340_v28, %v3296_v8  ;;  %v2704_v34 = vpop.f32.mrb[27].mxu0 }
0x110c   :  { %2987 = vtanh.f32 %v1342_v32  ;;  %v2441_v40 = vmul.f32 -1.442695, %v1342_v32 }
0x1113   :  { %v1262_v35 = vpop.f32.mrb[20].mxu1 }
0x1114   :  { %v2844_v19 = vadd.f32 %v3357_v29, %v1262_v35  ;;  %v2695_v36 = vpop.f32.mrb[21].mxu1 }
0x1115   :  { %v1265_v37 = vpop.f32.mrb[22].mxu1 }
0x1116   :  { %v2988_v38 = vpop.eup %2987  ;;  %2989 = vtanh.f32 %v2844_v19  ;;  %v2696_v39 = vpop.f32.mrb[23].mxu1  ;;  %v2439_v41 = vmul.f32 -1.442695, %v2844_v19 }
0x1117   :  { %1355 = vrot.lane.b32.xlu0 %v2988_v38, %s3140_s1  ;;  %2991 = vpow2.f32 %v2441_v40 }
0x1118   :  { %2993 = vpow2.f32 %v2439_v41 }
0x1120   :  { %v2990_v22 = vpop.eup %2989 }
0x1121   :  { %1278 = vrot.lane.b32.xlu1 %v2990_v22, %s3140_s1  ;;  %v2992_v42 = vpop.eup %2991 }
0x1122   :  { %v1346_v43 = vadd.f32 1.0, %v2992_v42  ;;  %v2994_v44 = vpop.eup %2993 }
0x1123   :  { %v1272_v46 = vadd.f32 1.0, %v2994_v44 }
0x1124   :  { %2995 = vrcp.f32 %v1346_v43 }
0x1125   :  { %2997 = vrcp.f32 %v1272_v46 }
0x112e   :  { %v2996_v47 = vpop.eup %2995 }
0x112f   :  { %v2998_v50 = vpop.eup %2997  ;;  %v1353_v54 = vmul.f32 %v2996_v47, %v1351_v53 }
0x1130   :  { %v1276_v58 = vmul.f32 %v2998_v50, %v3546_v11 }
0x1189   :  { %v1356_v48 = vpop.permute.xlu0 %1355 }
0x118a   :  { %v1358_v49 = vmul.f32 %v2996_v47, %v1356_v48 }
0x118c   :  { %1360 = vrot.lane.b32.xlu0 %v1358_v49, %s3144_s3 }
0x1193   :  { %v1279_v51 = vpop.permute.xlu1 %1278 }
0x1194   :  { %v1281_v52 = vmul.f32 %v2998_v50, %v1279_v51 }
0x1196   :  { %1283 = vrot.lane.b32.xlu1 %v1281_v52, %s3144_s3 }
0x11fe   :  { %v1361_v55 = vpop.permute.xlu0 %1360 }
0x11ff   :  { %v3585_v57 = vadd.f32 %v1361_v55, %v1353_v54 }
0x1201   :  { %2999 = vtanh.f32 %v3585_v57  ;;  %v1547_v22 = vrot.slane %v3585_v57, 6 }
0x1208   :  { %v1284_v59 = vpop.permute.xlu1 %1283 }
0x1209   :  { %v3589_v60 = vadd.f32 %v1284_v59, %v1276_v58 }
0x120b   :  { %v3000_v62 = vpop.eup %2999  ;;  %3001 = vtanh.f32 %v3589_v60 }
0x120c   :  { %1366 = vrot.lane.b32.xlu0 %v3000_v62, %s3140_s1 }
0x1215   :  { %v3002_v63 = vpop.eup %3001 }
0x1216   :  { %1289 = vrot.lane.b32.xlu1 %v3002_v63, %s3140_s1 }
0x127e   :  { %v1367_v0 = vpop.permute.xlu0 %1366 }
0x127f   :  { %v1369_v1 = vmul.f32 %v2996_v47, %v1367_v0 }
0x1281   :  { %v1370_v2 = vpack.c.bf16 %v1369_v1, %v1369_v1 }
0x1283   :  { %v1372_v3 = vrot.slane %v1370_v2, 2 }
0x1285   :  { %1373 = vrot.lane.b32.xlu0 %v1372_v3, %s3144_s3 }
0x1288   :  { %v1290_v5 = vpop.permute.xlu1 %1289 }
0x1289   :  { %v3595_v7 = vmul.f32 %v2998_v50, %v1290_v5 }
0x128b   :  { %v1293_v9 = vpack.c.bf16 %v3595_v7, %v3595_v7 }
0x128d   :  { %1419 = vrot.lane.b32.xlu1 %v1293_v9, %s3144_s3 }
0x12f7   :  { %v1374_v11 = vpop.permute.xlu0 %1373 }
0x12f8   :  { %2710 = vmatmul.mubr.msk.bf16.vlgmr.msra.gmra.mrb[28].mxu0 %vm224_vm2, %v1374_v11  ;;  %2726 = vmatmul.mubr.msk.bf16.vlgmr.msra.gmra.mrb[24].mxu1 %vm224_vm2, %v1374_v11 }
0x12f9   :  { %2714 = vmatpush3.bf16.msra.mxu0 %v3378_v4  ;;  %2717 = vmatprep.mubr.msk.bf16.mxu0 %vm3142_vm1, %v3141_v20 }
0x12fa   :  { %2715 = vmatprep.subr.bf16.mxu0 %v3141_v20  ;;  %2730 = vmatpush3.bf16.msra.mxu1 %v3306_v18 }
0x12fb   :  { %2731 = vmatprep.subr.bf16.mxu1 %v3141_v20  ;;  %2733 = vmatprep.mubr.msk.bf16.mxu1 %vm3142_vm1, %v3141_v20 }
0x12fd   :  { %2716 = vmatpush3.bf16.msra.mxu0 %v3386_v6 }
0x12fe   :  { %2732 = vmatpush3.bf16.msra.mxu1 %v3320_v21 }
0x12ff   :  { %2737 = vmatprep.subr.bf16.mxu1 %v3141_v20  ;;  %v1420_v12 = vpop.permute.xlu1 %1419 }
0x1304   :  { %2718 = vmatmul.mubr.msk.bf16.vlgmr.msra.gmra.mrb[28].mxu0 %vm224_vm2, %v1420_v12 }
0x13cb   :  { %v1529_v13 = vpop.f32.mrb[24].mxu1 }
0x13cc   :  { %v1536_v14 = vrot.slane %v1529_v13, 2  ;;  %v2727_v15 = vpop.f32.mrb[25].mxu1 }
0x13cd   :  { %v1532_v16 = vpop.f32.mrb[26].mxu1 }
0x13ce   :  { %v1538_v18 = vadd.f32 %v1536_v14, %v3296_v8  ;;  %v2728_v10 = vpop.f32.mrb[27].mxu1 }
0x13cf   :  { %v1693_v10 = vld [vmem:[%s3889_s30 + $0x8] sm:$0xff] }
0x13d0   :  { %3003 = vtanh.f32 %v1538_v18  ;;  %v2446_v30 = vmul.f32 -1.442695, %v1538_v18 }
0x13d7   :  { %v1458_v17 = vpop.f32.mrb[28].mxu0 }
0x13d8   :  { %v2845_v24 = vadd.f32 %v3357_v29, %v1458_v17  ;;  %v2719_v25 = vpop.f32.mrb[29].mxu0 }
0x13d9   :  { %v1461_v26 = vpop.f32.mrb[30].mxu0 }
0x13da   :  { %v3004_v27 = vpop.eup %3003  ;;  %3005 = vtanh.f32 %v2845_v24  ;;  %v2720_v21 = vpop.f32.mrb[31].mxu0  ;;  %v2444_v31 = vmul.f32 -1.442695, %v2845_v24 }
0x13db   :  { %1551 = vrot.lane.b32.xlu0 %v3004_v27, %s3140_s1  ;;  %3007 = vpow2.f32 %v2446_v30 }
0x13dc   :  { %3009 = vpow2.f32 %v2444_v31 }
0x13e4   :  { %v3006_v28 = vpop.eup %3005 }
0x13e5   :  { %1474 = vrot.lane.b32.xlu1 %v3006_v28, %s3140_s1  ;;  %v3008_v32 = vpop.eup %3007 }
0x13e6   :  { %v1542_v8 = vadd.f32 1.0, %v3008_v32  ;;  %v3010_v34 = vpop.eup %3009  ;;  %v2450_v32 = vld [vmem:[%s3890_s6] ss:$0 sm:$0xff] }
0x13e7   :  { %v1468_v35 = vadd.f32 1.0, %v3010_v34 }
0x13e8   :  { %3011 = vrcp.f32 %v1542_v8 }
0x13e9   :  { %3013 = vrcp.f32 %v1468_v35 }
0x13f2   :  { %v3012_v29 = vpop.eup %3011 }
0x13f3   :  { %v3014_v37 = vpop.eup %3013  ;;  %v1549_v40 = vmul.f32 %v3012_v29, %v1547_v22 }
0x13f4   :  { %v1472_v43 = vmul.f32 %v3014_v37, %v3589_v60  ;;  %v3045_v60 = vld [vmem:[%s3887_s4] ss:$0 sm:$0xff] }
0x144d   :  { %v1552_v19 = vpop.permute.xlu0 %1551 }
0x144e   :  { %v1554_v36 = vmul.f32 %v3012_v29, %v1552_v19  ;;  %v1786_v19 = vld [vmem:[%s3852_s11] sm:$0xff] }
0x1450   :  { %1556 = vrot.lane.b32.xlu0 %v1554_v36, %s3144_s3 }
0x1457   :  { %v1475_v38 = vpop.permute.xlu1 %1474 }
0x1458   :  { %v1477_v39 = vmul.f32 %v3014_v37, %v1475_v38 }
0x145a   :  { %1479 = vrot.lane.b32.xlu1 %v1477_v39, %s3144_s3 }
0x14c2   :  { %v1557_v41 = vpop.permute.xlu0 %1556 }
0x14c3   :  { %v1559_v42 = vadd.f32 %v1557_v41, %v1549_v40 }
0x14c5   :  { %3015 = vtanh.f32 %v1559_v42 }
0x14cc   :  { %v1480_v44 = vpop.permute.xlu1 %1479 }
0x14cd   :  { %v1482_v46 = vadd.f32 %v1480_v44, %v1472_v43 }
0x14cf   :  { %v3016_v47 = vpop.eup %3015  ;;  %3017 = vtanh.f32 %v1482_v46 }
0x14d0   :  { %1562 = vrot.lane.b32.xlu0 %v3016_v47, %s3140_s1  ;;  %v1787_v47 = vld [vmem:[%s3852_s11 + $0x8] sm:$0xff] }
0x14d9   :  { %v3018_v48 = vpop.eup %3017 }
0x14da   :  { %1485 = vrot.lane.b32.xlu1 %v3018_v48, %s3140_s1  ;;  %v3145_v48 = vmov 0  }
0x14db   :  { %2891 = vset.pattern.permute.xlu1 %v3145_v48  ;;  %2892 = vset.pattern.permute.xlu0 %v3145_v48 }
0x1542   :  { %v1563_v49 = vpop.permute.xlu0 %1562 }
0x1543   :  { %v1565_v50 = vmul.f32 %v3012_v29, %v1563_v49 }
0x1545   :  { %v1566_v51 = vpack.c.bf16 %v1565_v50, %v1565_v50 }
0x1547   :  { %v1568_v52 = vrot.slane %v1566_v51, 3  ;;  %v1911_v51 = vld [vmem:[%s3850_s9] sm:$0xff] }
0x1549   :  { %1569 = vrot.lane.b32.xlu0 %v1568_v52, %s3144_s3 }
0x154c   :  { %v1486_v53 = vpop.permute.xlu1 %1485 }
0x154d   :  { %v1488_v54 = vmul.f32 %v3014_v37, %v1486_v53 }
0x154f   :  { %v1489_v55 = vpack.c.bf16 %v1488_v54, %v1488_v54 }
0x1551   :  { %1615 = vrot.lane.b32.xlu1 %v1489_v55, %s3144_s3  ;;  %v1930_v55 = vld [vmem:[%s3851_s10 + $0x8] sm:$0xff] }
0x15bb   :  { %v1570_v57 = vpop.permute.xlu0 %1569 }
0x15bc   :  { %2734 = vmatmul.mubr.msk.bf16.vlgmr.msra.gmra.mrb[28].mxu1 %vm224_vm2, %v1570_v57 }
0x15bd   :  { %2738 = vmatpush3.bf16.msra.mxu1 %v3378_v4  ;;  %2741 = vmatprep.mubr.msk.bf16.mxu1 %vm3142_vm1, %v3141_v20 }
0x15be   :  { %2739 = vmatprep.subr.bf16.mxu1 %v3141_v20 }
0x15c1   :  { %2740 = vmatpush3.bf16.msra.mxu1 %v3386_v6 }
0x15c3   :  { %v1616_v58 = vpop.permute.xlu1 %1615 }
0x15c8   :  { %2742 = vmatmul.mubr.msk.bf16.vlgmr.msra.gmra.mrb[28].mxu1 %vm224_vm2, %v1616_v58 }
0x15c9   :  { %2778 = vmatprep.mubr.msk.f32.mxu1 %vm3142_vm1, %v3141_v20 }
0x169b   :  { %v1654_v59 = vpop.f32.mrb[28].mxu1 }
0x169c   :  { %v2846_v62 = vadd.f32 %v3045_v60, %v1654_v59  ;;  %v2743_v4 = vpop.f32.mrb[29].mxu1 }
0x169d   :  { %v1657_v63 = vpop.f32.mrb[30].mxu1 }
0x169e   :  { %3019 = vtanh.f32 %v2846_v62  ;;  %v2744_v0 = vpop.f32.mrb[31].mxu1  ;;  %v2449_v6 = vmul.f32 -1.442695, %v2846_v62  ;;  %v1912_v62 = vld [vmem:[%s3850_s9 + $0x8] sm:$0xff] }
0x16a0   :  { %3021 = vpow2.f32 %v2449_v6 }
0x16a8   :  { %v3020_v1 = vpop.eup %3019 }
0x16a9   :  { %1670 = vrot.lane.b32.xlu0 %v3020_v1, %s3140_s1 }
0x16aa   :  { %v3022_v2 = vpop.eup %3021 }
0x16ab   :  { %v1664_v3 = vadd.f32 1.0, %v3022_v2 }
0x16ad   :  { %3023 = vrcp.f32 %v1664_v3 }
0x16b7   :  { %v3024_v5 = vpop.eup %3023 }
0x16b8   :  { %v1668_v12 = vmul.f32 %v3024_v5, %v1482_v46 }
0x171b   :  { %v1671_v9 = vpop.permute.xlu0 %1670 }
0x171c   :  { %v1673_v11 = vmul.f32 %v3024_v5, %v1671_v9 }
0x171e   :  { %1675 = vrot.lane.b32.xlu1 %v1673_v11, %s3144_s3 }
0x1722   :  { %288 = vrot.lane.b32.xlu1 %v3368_v61, %s3144_s3 }
0x1726   :  { %711 = vrot.lane.b32.xlu1 %v3466_v45, %s3144_s3 }
0x172a   :  { %1099 = vrot.lane.b32.xlu1 %v3552_v23, %s3144_s3  ;;  %v1692_v23 = vld [vmem:[%s3889_s30] sm:$0xff] }
0x172b   :  { %v2807_v17 = vpack.c.bf16 %v1693_v10, %v1692_v23 }
0x172d   :  { %2808 = vmatprep.subr.bf16.mxu0 %v2807_v17 }
0x172e   :  { %1491 = vrot.lane.b32.xlu1 %v1488_v54, %s3144_s3  ;;  %2810 = vmatpush3.bf16.msra.mxu0 %v2807_v17  ;;  %v1929_v54 = vld [vmem:[%s3851_s10] sm:$0xff] }
0x1790   :  { %v1676_v13 = vpop.permute.xlu1 %1675 }
0x1791   :  { %v1678_v14 = vadd.f32 %v1676_v13, %v1668_v12 }
0x1793   :  { %3025 = vtanh.f32 %v1678_v14 }
0x1794   :  { %v289_v15 = vpop.permute.xlu1 %288 }
0x1795   :  { %292 = vst.msk [vmem:[#allocation2] sm:$0x3] %vm291_vm3, %v289_v15 }
0x1798   :  { %v712_v16 = vpop.permute.xlu1 %711 }
0x1799   :  { %714 = vst.msk [vmem:[#allocation2 + $0x4] sm:$0x3] %vm291_vm3, %v712_v16 }
0x179c   :  { %v1100_v61 = vpop.permute.xlu1 %1099 }
0x179d   :  { %v3026_v18 = vpop.eup %3025  ;;  %1102 = vst.msk [vmem:[#allocation2 + $0x8] sm:$0x3] %vm291_vm3, %v1100_v61 }
0x179e   :  { %1681 = vrot.lane.b32.xlu0 %v3026_v18, %s3140_s1 }
0x17a0   :  { %v1492_v45 = vpop.permute.xlu1 %1491 }
0x17a1   :  { %1494 = vst.msk [vmem:[#allocation2 + $0xc] sm:$0x3] %vm291_vm3, %v1492_v45 }
0x17a2   :  { %515 = vrot.lane.b32.xlu0 %v3423_v56, %s3144_s3  ;;  %v1694_v56 = vld [vmem:[%s3889_s30 + $0x10] sm:$0xff] }
0x17a6   :  { %907 = vrot.lane.b32.xlu0 %v3509_v33, %s3144_s3  ;;  %v1695_v33 = vld [vmem:[%s3889_s30 + $0x18] sm:$0xff] }
0x17aa   :  { %1295 = vrot.lane.b32.xlu0 %v3595_v7, %s3144_s3  ;;  %v2811_v7 = vpack.c.bf16 %v1695_v33, %v1694_v56  ;;  %v2455_v33 = vld [vmem:[%s3854_s13] ss:$0 sm:$0xff] }
0x17ac   :  { %2812 = vmatprep.subr.bf16.mxu0 %v2811_v7 }
0x17ad   :  { %2814 = vmatpush3.bf16.msra.mxu0 %v2811_v7 }
0x1810   :  { %v1682_v24 = vpop.permute.xlu0 %1681 }
0x1811   :  { %v1684_v25 = vmul.f32 %v3024_v5, %v1682_v24 }
0x1813   :  { %1686 = vrot.lane.b32.xlu0 %v1684_v25, %s3144_s3 }
0x1814   :  { %v516_v26 = vpop.permute.xlu0 %515 }
0x1815   :  { %518 = vst.msk [vmem:[#allocation2 + $0x2] sm:$0x3] %vm291_vm3, %v516_v26 }
0x1818   :  { %v908_v27 = vpop.permute.xlu0 %907 }
0x1819   :  { %910 = vst.msk [vmem:[#allocation2 + $0x6] sm:$0x3] %vm291_vm3, %v908_v27 }
0x181c   :  { %v1296_v21 = vpop.permute.xlu0 %1295 }
0x181d   :  { %1298 = vst.msk [vmem:[#allocation2 + $0xa] sm:$0x3] %vm291_vm3, %v1296_v21 }
0x1820   :  { %v1690_v28 = vld [vmem:[#allocation2] sm:$0xff] }
0x1821   :  { %2753 = vmatprep.mubr.msk.f32.mxu0 %vm224_vm2, %v1690_v28 }
0x1885   :  { %v1687_v30 = vpop.permute.xlu0 %1686 }
0x1886   :  { %1689 = vst.msk [vmem:[#allocation2 + $0xe] sm:$0x3] %vm291_vm3, %v1687_v30 }
0x188d   :  { %v1691_v31 = vld [vmem:[#allocation2 + $0x8] sm:$0xff] }
0x188e   :  { %2754 = vmatmul.mubr.msk.f32.vlgmr.msra.gmra.mrb[2].mxu0 %vm224_vm2, %v1691_v31  ;;  %v2456_v31 = vld [vmem:[#allocation3] ss:$0 sm:$0xff] }
0x188f   :  { %2760 = vmatprep.mubr.msk.f32.mxu0 %vm89_vm0, %v1786_v19 }
0x1961   :  { %v2755_v8 = vpop.f32.mrb[2].mxu0 }
0x1962   :  { %v1781_v34 = vadd.f32 %v2755_v8, %v2450_v32  ;;  %v1775_v35 = vpop.f32.mrb[3].mxu0 }
0x1963   :  { %v1776_v29 = vadd.f32 %v2450_v32, %v1775_v35 }
0x1964   :  { %3027 = vtanh.f32 %v1781_v34 }
0x1965   :  { %3029 = vtanh.f32 %v1776_v29 }
0x196e   :  { %v3683_v36 = vpop.eup %3027 }
0x196f   :  { %v3686_v37 = vpop.eup %3029  ;;  %v1789_v38 = vmul.f32 %v3683_v36, %v3683_v36 }
0x1970   :  { %v1788_v39 = vmul.f32 %v3686_v37, %v3686_v37 }
0x1972   :  { %v2886_v22 = vpack.i.bf16 %v1789_v38, %v1788_v39 }
0x1974   :  { %2887 = vrot.lane.b32.xlu1 %v2886_v22, %s3144_s3 }
0x19e6   :  { %v2888_v40 = vpop.permute.xlu1 %2887 }
0x19e7   :  { %v2890_v41 = vunpack.i.h.bf16 %v2888_v40  ;;  %v2889_v42 = vunpack.i.l.bf16 %v2888_v40 }
0x19e9   :  { %v1798_v43 = vsel %vm224_vm2, %v3686_v37, %v2889_v42  ;;  %v1799_v44 = vsel %vm224_vm2, %v3683_v36, %v2890_v41 }
0x19ea   :  { %v2815_v46 = vpack.c.bf16 %v1799_v44, %v1798_v43 }
0x19ec   :  { %2816 = vmatprep.subr.bf16.mxu0 %v2815_v46 }
0x19ed   :  { %2818 = vmatpush3.bf16.msra.mxu0 %v2815_v46 }
0x19f0   :  { %2761 = vmatmul.mubr.msk.f32.vlgmr.msra.gmra.mrb[32].mxu0 %vm89_vm0, %v1787_v47 }
0x19f1   :  { %2767 = vmatprep.mubr.msk.f32.mxu0 %vm3142_vm1, %v3141_v20 }
0x1ac3   :  { %v2762_v49 = vpop.f32.mrb[32].mxu0 }
0x1ac4   :  { %1891 = vrot.lane.b32.xlu1 %v2762_v49, %s3143_s14  ;;  %v1872_v50 = vpop.f32.mrb[33].mxu0  ;;  %v1884_v53 = vsel %vm224_vm2, %v2762_v49, 0.0  ;;  %v3146_v49 = vmov 0.0|0.0  }
0x1ac5   :  { %1889 = vrot.lane.b32.xlu0 %v1872_v50, %s3143_s14  ;;  %v1881_v52 = vsel %vm224_vm2, %v1872_v50, 0.0  ;;  %2819 = vmatprep.subr.bf16.mxu0 %v3146_v49 }
0x1ac6   :  { %2822 = vmatprep.subr.bf16.mxu1 %v3146_v49 }
0x1ac8   :  { %1919 = vperm.xlu1 %2891, %v1911_v51  }
0x1ae4   :  { %1882 = vadd.xlane.f32.xlu0 %v1881_v52 }
0x1aec   :  { %1885 = vadd.xlane.f32.xlu1 %v1884_v53 }
0x1afd   :  { %1933 = vperm.xlu1 %2891, %v1929_v54  }
0x1b01   :  { %1938 = vperm.xlu1 %2891, %v1930_v55  }
0x1b36   :  { %v1892_v57 = vpop.permute.xlu1 %1891 }
0x1b37   :  { %v1898_v58 = vsel %vm224_vm2, %v1892_v57, 0.0  ;;  %v1890_v59 = vpop.permute.xlu0 %1889 }
0x1b38   :  { %1899 = vadd.xlane.f32.xlu0 %v1898_v58  ;;  %v1895_v60 = vsel %vm224_vm2, %v1890_v59, 0.0  ;;  %v1983_v58 = vld [vmem:[%s3853_s12] sm:$0x3] }
0x1b39   :  { %v2077_v59 = vld [vmem:[%s3856_s15] sm:$0xff] }
0x1b3c   :  { %1896 = vadd.xlane.f32.xlu0 %v1895_v60  ;;  %v2078_v60 = vld [vmem:[%s3856_s15 + $0x8] sm:$0xff] }
0x1b47   :  { %v1920_v4 = vpop.permute.xlu1 %1919 }
0x1b52   :  { %1924 = vperm.xlu0 %2892, %v1912_v62   ;;  %v2079_v62 = vld [vmem:[%s3856_s15 + $0x10] sm:$0xff] }
0x1b71   :  { %v1883_v63 = vpop.xlane.xlu0 %1882 }
0x1b72   :  { %v1901_v3 = vmul.f32 %v1883_v63, %v1883_v63  ;;  %v1913_v23 = vsub.f32 %v3686_v37, %v1883_v63  ;;  %v2080_v63 = vld [vmem:[%s3856_s15 + $0x18] sm:$0xff] }
0x1b79   :  { %v1886_v0 = vpop.xlane.xlu1 %1885 }
0x1b7a   :  { %v1902_v1 = vmul.f32 %v1886_v0, %v1886_v0  ;;  %v1914_v16 = vsub.f32 %v3683_v36, %v1886_v0  ;;  %v2826_v0 = vpack.c.bf16 %v2080_v63, %v2079_v62 }
0x1b7d   :  { %v1934_v15 = vpop.permute.xlu1 %1933 }
0x1b81   :  { %v1939_v56 = vpop.permute.xlu1 %1938 }
0x1bc5   :  { %v1900_v6 = vpop.xlane.xlu0 %1899 }
0x1bc6   :  { %v1904_v2 = vsub.f32 %v1900_v6, %v1902_v1 }
0x1bc8   :  { %v1906_v5 = vmax.f32 %v1904_v2, 0.0  ;;  %v2162_v2 = vld [vmem:[%s3858_s17] sm:$0xff] }
0x1bc9   :  { %v1897_v9 = vpop.xlane.xlu0 %1896 }
0x1bca   :  { %v1908_v11 = vadd.f32 1e-05, %v1906_v5  ;;  %v1903_v12 = vsub.f32 %v1897_v9, %v1901_v3  ;;  %v2163_v3 = vld [vmem:[%s3858_s17 + $0x8] sm:$0xff] }
0x1bcb   :  { %v2829_v5 = vpack.c.bf16 %v2163_v3, %v2162_v2 }
0x1bcc   :  { %3031 = vrsqrt.f32 %v1908_v11  ;;  %v1905_v13 = vmax.f32 %v1903_v12, 0.0 }
0x1bce   :  { %v1907_v14 = vadd.f32 1e-05, %v1905_v13  ;;  %v2164_v13 = vld [vmem:[%s3858_s17 + $0x10] sm:$0xff] }
0x1bd0   :  { %3033 = vrsqrt.f32 %v1907_v14  ;;  %v2165_v14 = vld [vmem:[%s3858_s17 + $0x18] sm:$0xff] }
0x1bd1   :  { %v1925_v18 = vpop.permute.xlu0 %1924 }
0x1bd6   :  { %v3032_v61 = vpop.eup %3031 }
0x1bd7   :  { %v1916_v45 = vmul.f32 %v3032_v61, %v1914_v16  ;;  %v2247_v16 = vld [vmem:[%s3860_s19] sm:$0xff]  ;;  %v2248_v61 = vld [vmem:[%s3860_s19 + $0x8] sm:$0xff] }
0x1bd9   :  { %v1928_v10 = vmul.f32 %v1925_v18, %v1916_v45  ;;  %v2835_v18 = vpack.c.bf16 %v2248_v61, %v2247_v16 }
0x1bda   :  { %v3034_v17 = vpop.eup %3033 }
0x1bdb   :  { %v1942_v7 = vadd.f32 %v1939_v56, %v1928_v10  ;;  %v1915_v24 = vmul.f32 %v3034_v17, %v1913_v23  ;;  %v2249_v56 = vld [vmem:[%s3860_s19 + $0x10] sm:$0xff] }
0x1bdd   :  { %v1951_v25 = vmul.f32 %v2455_v33, %v1942_v7  ;;  %v1927_v26 = vmul.f32 %v1920_v4, %v1915_v24  ;;  %v2823_v4 = vpack.c.bf16 %v2078_v60, %v2077_v59  ;;  %v2460_v24 = vld [vmem:[%s3859_s18] ss:$0 sm:$0xff]  ;;  %s3147_s18 = smov [#allocation6]  }
0x1bdf   :  { %v1955_v27 = vsel %vm224_vm2, %v1951_v25, 0.0  ;;  %v1941_v21 = vadd.f32 %v1934_v15, %v1927_v26  ;;  %2824 = vmatpush3.bf16.msra.mxu1 %v2823_v4  ;;  %v2832_v15 = vpack.c.bf16 %v2165_v14, %v2164_v13 }
0x1be0   :  { %1956 = vadd.xlane.f32.xlu0 %v1955_v27  ;;  %2825 = vmatprep.subr.bf16.mxu1 %v3146_v49 }
0x1be1   :  { %v1950_v28 = vmul.f32 %v2455_v33, %v1941_v21  ;;  %v2250_v33 = vld [vmem:[%s3860_s19 + $0x18] sm:$0xff]  ;;  %s2363_s19 = sshll.u32 %s3147_s18, 4  ;;  %s2364_s19 = int_to_ptr.vmem [resolvable:$true] %s2363_s19 }
0x1be2   :  { %p3051_p1 = scmp.lt.s32.totalorder %s2364_s19, %s2364_s19 }
0x1be3   :  { %v1952_v30 = vsel %vm224_vm2, %v1950_v28, 0.0  ;;  %2827 = vmatpush3.bf16.msra.mxu1 %v2826_v0  ;;  %v2462_v28 = vld [vmem:[%s3861_s20] ss:$0 sm:$0xff]  ;;  %s3046_s20 = scalar_lea.vmem %s2364_s19, 32 }
0x1be4   :  { %1953 = vadd.xlane.f32.xlu1 %v1952_v30  ;;  %2834 = vmatprep.subr.bf16.mxu1 %v3146_v49  ;;  %p3047_p0 = scmp.ne.s32.totalorder %s2364_s19, %s3046_s20  ;;  %p3052_p2 = scmp.lt.s32.totalorder %s3046_s20, %s3046_s20 }
0x1be6   :  { %p3053_p3 = por %p3052_p2, %p3051_p1 }
0x1be8   :  { %p3054_p4 = pnand %p3053_p3, %p3047_p0 }
0x1c6d   :  { %v1957_v32 = vpop.xlane.xlu0 %1956 }
0x1c6e   :  { %v1966_v8 = vadd.f32 %v2456_v31, %v1957_v32 }
0x1c70   :  { %v1969_v29 = vsel %vm1967_vm4, %v1966_v8, -inf }
0x1c71   :  { %v1954_v34 = vpop.xlane.xlu1 %1953 }
0x1c72   :  { %v1965_v35 = vadd.f32 %v2456_v31, %v1954_v34 }
0x1c74   :  { %v1968_v19 = vsel %vm1967_vm4, %v1965_v35, -inf }
0x1c75   :  { %v1970_v36 = vmax.f32 %v1968_v19, %v1969_v29 }
0x1c77   :  { %v1971_v37 = vrot.slane %v1970_v36, 4 }
0x1c79   :  { %v1972_v38 = vmax.f32 %v1970_v36, %v1971_v37 }
0x1c7b   :  { %v1973_v39 = vrot.slane %v1972_v38, 2 }
0x1c7d   :  { %v1974_v22 = vmax.f32 %v1972_v38, %v1973_v39 }
0x1c7f   :  { %v1975_v40 = vrot.slane %v1974_v22, 1 }
0x1c81   :  { %v1976_v41 = vmax.f32 %v1974_v22, %v1975_v40 }
0x1c83   :  { %v1977_v42 = vsub.f32 %v1965_v35, %v1976_v41  ;;  %v1978_v43 = vsub.f32 %v1966_v8, %v1976_v41 }
0x1c85   :  { %v1979_v44 = vmul.f32 1.442695, %v1977_v42  ;;  %v1981_v46 = vmul.f32 1.442695, %v1978_v43 }
0x1c87   :  { %3035 = vpow2.f32 %v1979_v44 }
0x1c88   :  { %3037 = vpow2.f32 %v1981_v46 }
0x1c91   :  { %v3036_v47 = vpop.eup %3035 }
0x1c92   :  { %v3038_v48 = vpop.eup %3037  ;;  %1986 = vperm.xlu1 %2891, %v3036_v47  }
0x1c93   :  { %1991 = vperm.xlu0 %2892, %v3038_v48  }
0x1d11   :  { %v1987_v50 = vpop.permute.xlu1 %1986 }
0x1d12   :  { %v1992_v51 = vpop.permute.xlu0 %1991  ;;  %v1994_v52 = vmul.f32 %v1987_v50, %v1941_v21 }
0x1d13   :  { %v1995_v53 = vmul.f32 %v1992_v51, %v1942_v7  ;;  %v2838_v7 = vpack.c.bf16 %v2250_v33, %v2249_v56 }
0x1d14   :  { %v1996_v54 = vsel %vm224_vm2, %v1994_v52, %v1987_v50 }
0x1d15   :  { %v1997_v55 = vsel %vm224_vm2, %v1995_v53, %v1992_v51 }
0x1d16   :  { %v2820_v57 = vpack.c.bf16 %v1997_v55, %v1996_v54 }
0x1d18   :  { %2821 = vmatpush3.bf16.msra.mxu0 %v2820_v57 }
0x1d19   :  { %2828 = vmatprep.subr.bf16.mxu0 %v3146_v49 }
0x1d1b   :  { %2768 = vmatmul.mubr.msk.f32.vlgmr.msra.gmra.mrb[34].mxu0 %vm89_vm0, %v1983_v58 }
0x1d1c   :  { %2789 = vmatprep.mubr.msk.f32.mxu0 %vm3142_vm1, %v3141_v20  ;;  %2830 = vmatpush3.bf16.msra.mxu0 %v2829_v5 }
0x1d1d   :  { %2831 = vmatprep.subr.bf16.mxu0 %v3146_v49 }
0x1d20   :  { %2833 = vmatpush3.bf16.msra.mxu0 %v2832_v15 }
0x1dee   :  { %v2067_v1 = vpop.f32.mrb[34].mxu0 }
0x1def   :  { %3039 = vrcp.f32 %v2067_v1  ;;  %v2769_v6 = vpop.f32.mrb[35].mxu0 }
0x1df9   :  { %v3040_v9 = vpop.eup %3039 }
0x1dfa   :  { %2073 = vrot.lane.b32.xlu1 %v3040_v9, %s3143_s14 }
0x1e6c   :  { %v2074_v11 = vpop.permute.xlu1 %2073 }
0x1e6d   :  { %v2076_v12 = vmul.f32 %v2074_v11, %v2067_v1 }
0x1e6f   :  { %2346 = vst.msk [vmem:[#allocation9] sm:$0x3] %vm291_vm3, %v2076_v12  ;;  %2779 = vmatmul.mubr.msk.f32.vlgmr.msra.gmra.mrb[32].mxu1 %vm224_vm2, %v2076_v12 }
0x1e70   :  { %2800 = vmatprep.mubr.msk.f32.mxu1 %vm3142_vm1, %v3141_v20  ;;  %2836 = vmatpush3.bf16.msra.mxu1 %v2835_v18  ;;  %v2458_v20 = vld [vmem:[%s3857_s16] ss:$0 sm:$0xff] }
0x1e71   :  { %2837 = vmatprep.subr.bf16.mxu1 %v3146_v49 }
0x1e74   :  { %2839 = vmatpush3.bf16.msra.mxu1 %v2838_v7 }
0x1f42   :  { %v2157_v45 = vpop.f32.mrb[32].mxu1 }
0x1f43   :  { %v2158_v23 = vadd.f32 %v2458_v20, %v2157_v45  ;;  %v2780_v10 = vpop.f32.mrb[33].mxu1 }
0x1f45   :  { %v2161_v17 = vmax.f32 %v2158_v23, 0.0 }
0x1f47   :  { %2790 = vmatmul.mubr.msk.f32.vlgmr.msra.gmra.mrb[36].mxu0 %vm224_vm2, %v2161_v17 }
0x201a   :  { %v2242_v25 = vpop.f32.mrb[36].mxu0 }
0x201b   :  { %v2243_v26 = vadd.f32 %v2460_v24, %v2242_v25  ;;  %v2791_v27 = vpop.f32.mrb[37].mxu0 }
0x201d   :  { %v2246_v21 = vmax.f32 %v2243_v26, 0.0 }
0x201f   :  { %2345 = vst.msk [vmem:[#allocation8] sm:$0x3] %vm291_vm3, %v2246_v21  ;;  %2801 = vmatmul.mubr.msk.f32.vlgmr.msra.gmra.mrb[34].mxu1 %vm224_vm2, %v2246_v21 }
0x20f2   :  { %v2327_v30 = vpop.f32.mrb[34].mxu1 }
0x20f3   :  { %v2328_v31 = vadd.f32 %v2462_v28, %v2327_v30  ;;  %v2802_v32 = vpop.f32.mrb[35].mxu1 }
0x20f5   :  { %v2332_v8 = vsel %vm2331_vm5, %v2328_v31, -inf  ;;  %2344 = vst.msk [vmem:[#allocation6] sm:$0x3] %vm2331_vm5, %v2328_v31 }
0x20f6   :  { %2333 = vmax.xlane.f32.xlu1 %v2332_v8 }
0x2183   :  { %v2334_v34 = vpop.xlane.xlu1 %2333 }
0x2184   :  { %v2335_v35 = vsub.f32 %v2328_v31, %v2334_v34 }
0x2186   :  { %v2336_v29 = vmul.f32 1.442695, %v2335_v35 }
0x2188   :  { %3041 = vpow2.f32 %v2336_v29 }
0x2192   :  { %v3042_v19 = vpop.eup %3041 }
0x2193   :  { %v2338_v36 = vsel %vm2331_vm5, %v3042_v19, 0.0 }
0x2194   :  { %2339 = vadd.xlane.f32.xlu0 %v2338_v36 }
0x2195   :  { %3057 = shalt.err (!%p3054_p4)
}
0x2196   :  { %s3058_s3 = scalar_lea.hbm %s3863_s22, 32 }
0x2197   :  { %p3059_p5 = scmp.ne.s32.totalorder %s3863_s22, %s3058_s3  ;;  %p3062_p6 = scmp.lt.u32.totalorder %s3058_s3, %s3863_s22 }
0x2199   :  { %p3064_p7 = pnand %p3062_p6, %p3059_p5 }
0x219b   :  { %3067 = shalt.err (!%p3064_p7)
}
0x219c   :  { %2366 = dma.vmem_to_hbm [thread:$0]  %s2364_s19, 32, %s3863_s22, [#allocation7]  }
0x219d   :  { %s3148_s4 = smov [#allocation8]  }
0x219e   :  { %s2373_s14 = sshll.u32 %s3148_s4, 4  ;;  %s2374_s14 = int_to_ptr.vmem [resolvable:$true] %s2373_s14 }
0x219f   :  { %s3068_s5 = scalar_lea.vmem %s2374_s14, 32  ;;  %p3073_p9 = scmp.lt.s32.totalorder %s2374_s14, %s2374_s14 }
0x21a0   :  { %p3069_p8 = scmp.ne.s32.totalorder %s2374_s14, %s3068_s5  ;;  %p3074_p10 = scmp.lt.s32.totalorder %s3068_s5, %s3068_s5 }
0x21a2   :  { %p3075_p11 = por %p3074_p10, %p3073_p9 }
0x21a4   :  { %p3076_p12 = pnand %p3075_p11, %p3069_p8 }
0x21a6   :  { %3079 = shalt.err (!%p3076_p12)
}
0x21a7   :  { %s3080_s13 = scalar_lea.hbm %s3864_s23, 32 }
0x21a8   :  { %p3081_p13 = scmp.ne.s32.totalorder %s3864_s23, %s3080_s13  ;;  %p3084_p0 = scmp.lt.u32.totalorder %s3080_s13, %s3864_s23 }
0x21aa   :  { %p3086_p1 = pnand %p3084_p0, %p3081_p13 }
0x21ac   :  { %3089 = shalt.err (!%p3086_p1)
}
0x21ad   :  { %2376 = dma.vmem_to_hbm [thread:$0]  %s2374_s14, 32, %s3864_s23, [#allocation7]  }
0x21ae   :  { %s3149_s2 = smov [#allocation9]  }
0x21af   :  { %s2383_s29 = sshll.u32 %s3149_s2, 4  ;;  %s2384_s29 = int_to_ptr.vmem [resolvable:$true] %s2383_s29 }
0x21b0   :  { %s3090_s16 = scalar_lea.vmem %s2384_s29, 32  ;;  %p3095_p3 = scmp.lt.s32.totalorder %s2384_s29, %s2384_s29 }
0x21b1   :  { %p3091_p2 = scmp.ne.s32.totalorder %s2384_s29, %s3090_s16  ;;  %p3096_p4 = scmp.lt.s32.totalorder %s3090_s16, %s3090_s16 }
0x21b3   :  { %p3097_p5 = por %p3096_p4, %p3095_p3 }
0x21b5   :  { %p3098_p6 = pnand %p3097_p5, %p3091_p2 }
0x21b7   :  { %3101 = shalt.err (!%p3098_p6)
}
0x21b8   :  { %s3102_s19 = scalar_lea.hbm %s3865_s24, 32 }
0x21b9   :  { %p3103_p7 = scmp.ne.s32.totalorder %s3865_s24, %s3102_s19  ;;  %p3106_p8 = scmp.lt.u32.totalorder %s3102_s19, %s3865_s24 }
0x21bb   :  { %p3108_p9 = pnand %p3106_p8, %p3103_p7 }
0x21bd   :  { %3111 = shalt.err (!%p3108_p9)
}
0x21be   :  { %2386 = dma.vmem_to_hbm [thread:$0]  %s2384_s29, 32, %s3865_s24, [#allocation10]  }
0x21bf   :  { %s3150_s11 = smov [#allocation4]  }
0x21c0   :  { %s2353_s25 = sshll.u32 %s3150_s11, 4  ;;  %s2354_s25 = int_to_ptr.vmem [resolvable:$true] %s2353_s25 }
0x21c1   :  { %s3112_s15 = scalar_lea.vmem %s2354_s25, 32  ;;  %p3117_p11 = scmp.lt.s32.totalorder %s2354_s25, %s2354_s25 }
0x21c2   :  { %p3113_p10 = scmp.ne.s32.totalorder %s2354_s25, %s3112_s15  ;;  %p3118_p12 = scmp.lt.s32.totalorder %s3112_s15, %s3112_s15 }
0x21c4   :  { %p3119_p13 = por %p3118_p12, %p3117_p11 }
0x21c6   :  { %p3120_p0 = pnand %p3119_p13, %p3113_p10 }
0x2221   :  { %v2340_v37 = vpop.xlane.xlu0 %2339 }
0x2222   :  { %3043 = vrcp.f32 %v2340_v37 }
0x222c   :  { %v3044_v38 = vpop.eup %3043 }
0x222d   :  { %v2342_v39 = vmul.f32 %v3044_v38, %v3042_v19 }
0x222f   :  { %2343 = vst.msk [vmem:[#allocation4] sm:$0x3] %vm2331_vm5, %v2342_v39 }
0x2230   :  { %3123 = shalt.err (!%p3120_p0)
}
0x2231   :  { %s3124_s24 = scalar_lea.hbm %s3862_s21, 32 }
0x2232   :  { %p3125_p1 = scmp.ne.s32.totalorder %s3862_s21, %s3124_s24  ;;  %p3128_p2 = scmp.lt.u32.totalorder %s3124_s24, %s3862_s21 }
0x2234   :  { %p3130_p3 = pnand %p3128_p2, %p3125_p1 }
0x2236   :  { %3133 = shalt.err (!%p3130_p3)
}
0x2237   :  { %2356 = dma.vmem_to_hbm [thread:$0]  %s2354_s25, 32, %s3862_s21, [#allocation5]  }
0x2238   :  { %3134 = dma.done.wait [#allocation5], 32  }
0x2239   :  { %3135 = vsyncadd [#allocation5], 4294967264 }
0x223a   :  { %3136 = dma.done.wait [#allocation7], 64  }
0x223b   :  { %3137 = vsyncadd [#allocation7], 4294967232 }
0x223c   :  { %3138 = dma.done.wait [#allocation10], 32  }
0x223d   :  { %3139 = vsyncadd [#allocation10], 4294967264 }
0x223e   :  { %2399 = vsyncpa [#allocation5], 1 }
0x223f   :  { %2400 = vsyncpa [#allocation7], 1 }
0x2240   :  { %2401 = vsyncpa [#allocation10], 1 }

</bundles_post_ra>
